<compile_context>
chip_gen: v7x
topology: tpu7x:2x2x1
jax: 0.10.0
libtpu: 0.0.40
codegen_flags: <defaults>
</compile_context>

<pallas_src>
import functools
import math

import jax
import jax.numpy as jnp
from jax import lax
from jax.experimental import pallas as pl
from jax.experimental.pallas import tpu as pltpu


def _mha_kernel(x_ref, wqkv_ref, bqkv_ref, wet_ref, bet_ref, mask_ref,
                wot_ref, bo_ref, o_ref, q_scr, kbd_scr, vbd_scr,
                *, nhead, head_dim, block_q, compute_dtype):
    HD = nhead * head_dim               # concatenated head width (== 128 here)
    qi = pl.program_id(1)

    # ---- once per batch (first query tile): projections shared by all tiles.
    @pl.when(qi == 0)
    def _():
        x = x_ref[0].astype(compute_dtype)                          # (N, C)

        # One fused projection matmul for all heads: [QW | KW | VW], f32 acc.
        # (1/sqrt(D) is pre-folded into the Q columns + Q bias on the host.)
        qkv = jnp.dot(x, wqkv_ref[...],
                      preferred_element_type=jnp.float32) + bqkv_ref[...]

        q_scr[...] = qkv[:, :HD].astype(compute_dtype)              # (N, HD)

        # Shared Linformer E/F projection of K and V for all heads, with W_E
        # pre-tiled H times on the host: M = H*k = 128 (lane/MXU friendly).
        kv = qkv[:, HD:].astype(compute_dtype)                      # (N, 2*HD)
        ep = jnp.dot(wet_ref[...], kv,
                     preferred_element_type=jnp.float32) + bet_ref[...]
        # Block-diagonalize with the constant 0/1 head mask (one VPU multiply
        # per half); no per-head slicing, no transpose.
        mask = mask_ref[...]
        kbd_scr[...] = ep[:, :HD].astype(compute_dtype) * mask      # (H*k, HD)
        vbd_scr[...] = ep[:, HD:].astype(compute_dtype) * mask      # (H*k, HD)

    # ---- per query tile ------------------------------------------------------
    off = pl.multiple_of(qi * block_q, block_q)
    q_tile = q_scr[pl.ds(off, block_q), :]                          # (TQ, HD)

    # All-head scores in one matmul; kbd is consumed in its native layout
    # (contract the last dim of both operands -> no explicit transpose).
    s = lax.dot_general(q_tile, kbd_scr[...],
                        dimension_numbers=(((1,), (1,)), ((), ())),
                        preferred_element_type=jnp.float32)         # (TQ, H*k)

    # Fused, lane-dense segmented softmax (exact: shift-invariant per head).
    s = s - jnp.max(s, axis=-1, keepdims=True)
    p = jnp.exp(s)
    # Per-head denominators, broadcast back across each head's lanes, via one
    # matmul against the constant block-diag ones mask (MXU has slack here).
    denom = jnp.dot(p.astype(compute_dtype), mask_ref[...],
                    preferred_element_type=jnp.float32)             # (TQ, H*k)
    p = p * pl.reciprocal(denom, approx=True)

    # All-head context in one matmul -> already the concatenated head output.
    ctx = jnp.dot(p.astype(compute_dtype), vbd_scr[...],
                  preferred_element_type=jnp.float32)               # (TQ, HD)

    out = jnp.dot(ctx.astype(compute_dtype), wot_ref[...],
                  preferred_element_type=jnp.float32) + bo_ref[...]  # (TQ, C)
    o_ref[0] = out.astype(o_ref.dtype)


def mh_attention_forward(x, params, *, block_q=128, compute_dtype=jnp.bfloat16):
    """Pallas implementation of MHAttention.forward (eval mode)."""
    B, N, C = x.shape
    H, D, _ = params["w_q"].shape
    HD = H * D
    kproj = params["W_E"].shape[0]          # == dim (== D) in this module
    HK = H * kproj
    assert kproj == D, "shared E/F projection length equals head dim here"
    assert HD == HK
    block_q = min(block_q, N)
    assert N % block_q == 0 and N % 8 == 0
    assert C % 128 == 0 and HD % 128 == 0, "lane-dense layout assumption"
    inv_sqrt_d = 1.0 / math.sqrt(D)

    # ---- host-side constant folding (weights only, never runtime inputs) ----
    def fold(to_w, head_w):
        # (x @ to_w.T) @ head_w[h].T == x @ (to_w.T @ head_w[h].T)
        a = jnp.einsum("dc,hed->che", to_w, head_w)          # (C, H, D)
        return a.reshape(C, HD)

    w_q = fold(params["to_q"], params["w_q"]) * inv_sqrt_d   # fold score scale
    w_k = fold(params["to_k"], params["w_k"])
    w_v = fold(params["to_v"], params["w_v"])
    w_qkv = jnp.concatenate([w_q, w_k, w_v], axis=1).astype(compute_dtype)
    b_qkv = jnp.concatenate([
        (params["b_q"] * inv_sqrt_d).reshape(HD),
        params["b_k"].reshape(HD),
        params["b_v"].reshape(HD),
    ]).reshape(1, 3 * HD).astype(jnp.float32)

    # Shared E == F, tiled H times along rows so the in-kernel projection has
    # M = H*k and directly feeds the block-diagonal operands.
    w_e_t = jnp.tile(params["W_E"], (H, 1)).astype(compute_dtype)   # (HK, N)
    b_e_t = jnp.tile(params["b_E"], H).reshape(HK, 1).astype(jnp.float32)

    # Constant 0/1 block-diag head mask: mask[m, d] = 1 iff m//k == d//D.
    row_head = jnp.arange(HK) // kproj
    col_head = jnp.arange(HD) // D
    mask = (row_head[:, None] == col_head[None, :]).astype(compute_dtype)

    w_o_t = params["w_o"].T.astype(compute_dtype)            # (HD, C)
    b_o = params["b_o"].reshape(1, C).astype(jnp.float32)

    kernel = functools.partial(_mha_kernel, nhead=H, head_dim=D,
                               block_q=block_q, compute_dtype=compute_dtype)

    # Invariant weights: constant block index -> Pallas skips the re-copy.
    const = lambda shape: pl.BlockSpec(shape, lambda b, q: (0, 0))

    return pl.pallas_call(
        kernel,
        out_shape=jax.ShapeDtypeStruct((B, N, C), x.dtype),
        grid=(B, N // block_q),
        in_specs=[
            pl.BlockSpec((1, N, C), lambda b, q: (b, 0, 0)),   # x (full seq)
            const((C, 3 * HD)), const((1, 3 * HD)),            # fused QKV proj
            const((HK, N)), const((HK, 1)),                    # tiled E/F proj
            const((HK, HD)),                                   # block-diag mask
            const((HD, C)), const((1, C)),                     # output proj
        ],
        out_specs=pl.BlockSpec((1, block_q, C), lambda b, q: (b, q, 0)),
        scratch_shapes=[
            pltpu.VMEM((N, HD), compute_dtype),    # q_all (scaled, biased)
            pltpu.VMEM((HK, HD), compute_dtype),   # block-diag K projection
            pltpu.VMEM((HK, HD), compute_dtype),   # block-diag V projection
        ],
        compiler_params=pltpu.CompilerParams(
            dimension_semantics=("parallel", "arbitrary"),
            vmem_limit_bytes=32 * 1024 * 1024),
    )(x, w_qkv, b_qkv, w_e_t, b_e_t, mask, w_o_t, b_o)


def reference_forward(x, p):
    """Plain-JAX f32 replica of the PyTorch forward (eval mode)."""
    d = p["w_q"].shape[-1]
    Q = jnp.einsum("bnc,dc->bnd", x, p["to_q"])
    K = jnp.einsum("bnc,dc->bnd", x, p["to_k"])
    V = jnp.einsum("bnc,dc->bnd", x, p["to_v"])
    heads = []
    for h in range(p["w_q"].shape[0]):
        KW = jnp.einsum("bnd,ed->bne", K, p["w_k"][h]) + p["b_k"][h]
        KWt = jnp.swapaxes(KW, 1, 2)                                   # (B, d, N)
        KWe = jnp.einsum("bdn,kn->bdk", KWt, p["W_E"]) + p["b_E"]      # (B, d, k)
        QW = jnp.einsum("bnd,ed->bne", Q, p["w_q"][h]) + p["b_q"][h]
        scores = jnp.einsum("bnd,bdk->bnk", QW, KWe) / jnp.sqrt(jnp.float32(d))
        P = jax.nn.softmax(scores, axis=-1)
        VW = jnp.einsum("bnd,ed->bne", V, p["w_v"][h]) + p["b_v"][h]
        VWt = jnp.swapaxes(VW, 1, 2)
        VWf = jnp.einsum("bdn,kn->bdk", VWt, p["W_E"]) + p["b_E"]      # (B, d, k)
        VWf = jnp.swapaxes(VWf, 1, 2)                                  # (B, k, d)
        heads.append(jnp.einsum("bnk,bkd->bnd", P, VWf))
    out = jnp.concatenate(heads, axis=2)
    return jnp.einsum("bnh,ch->bnc", out, p["w_o"]) + p["b_o"]


def init_params(key, input_size, channels, dim, nhead):
    """Mimics the PyTorch module's initializers."""
    ks = jax.random.split(key, 13)
    u = lambda k, shape, b: jax.random.uniform(k, shape, jnp.float32, -b, b)
    bc = 1.0 / math.sqrt(channels)
    bd = 1.0 / math.sqrt(dim)
    bn = 1.0 / math.sqrt(input_size)
    bo = 1.0 / math.sqrt(dim * nhead)
    xav = math.sqrt(2.0 / (input_size + dim))
    return {
        "to_q": u(ks[0], (dim, channels), bc),   # Linear(channels, dim, bias=False)
        "to_k": u(ks[1], (dim, channels), bc),
        "to_v": u(ks[2], (dim, channels), bc),
        "w_q": u(ks[3], (nhead, dim, dim), bd), "b_q": u(ks[4], (nhead, dim), bd),
        "w_k": u(ks[5], (nhead, dim, dim), bd), "b_k": u(ks[6], (nhead, dim), bd),
        "w_v": u(ks[7], (nhead, dim, dim), bd), "b_v": u(ks[8], (nhead, dim), bd),
        # shared E == F : Linear(input_size, dim), xavier_normal weight
        "W_E": xav * jax.random.normal(ks[9], (dim, input_size), jnp.float32),
        "b_E": u(ks[10], (dim,), bn),
        "w_o": u(ks[11], (channels, dim * nhead), bo),
        "b_o": u(ks[12], (channels,), bo),
    }


if __name__ == "__main__":
    # batch=2, seq(input_size)=256, channels=128, dim=32, nhead=4
    # (dim_k / dim_ff / checkpoint_level from the ctor do not affect this
    #  forward path: E/F are built with `dim`, and checkpointing is a no-op
    #  for forward math.)
    B, INPUT_SIZE, CHANNELS, DIM, NHEAD = 2, 256, 128, 32, 4

    key = jax.random.PRNGKey(0)
    kx, kp = jax.random.split(key)
    x = jax.random.normal(kx, (B, INPUT_SIZE, CHANNELS), jnp.float32)
    params = init_params(kp, INPUT_SIZE, CHANNELS, DIM, NHEAD)

    out = jax.block_until_ready(mh_attention_forward(x, params, block_q=128))
    ref = jax.block_until_ready(reference_forward(x, params))

    assert out.shape == (B, INPUT_SIZE, CHANNELS)
    max_err = float(jnp.max(jnp.abs(out - ref)))
    # bf16 MXU operands + approx reciprocal -> loosened tolerance vs f32 ref.
    assert jnp.allclose(out, ref, atol=3e-2, rtol=3e-2), (
        f"mismatch vs reference, max abs err={max_err}")
    print("KERNEL_OK")
</pallas_src>

<mosaic_0001>
module attributes {stable_mosaic.version = 11 : i64} {
  func.func @_mha_kernel(%arg0: i32, %arg1: i32, %arg2: memref<1x256x128xf32, #tpu.memory_space<vmem>>, %arg3: memref<128x384xbf16, #tpu.memory_space<vmem>>, %arg4: memref<1x384xf32, #tpu.memory_space<vmem>>, %arg5: memref<128x256xbf16, #tpu.memory_space<vmem>>, %arg6: memref<128x1xf32, #tpu.memory_space<vmem>>, %arg7: memref<128x128xbf16, #tpu.memory_space<vmem>>, %arg8: memref<128x128xbf16, #tpu.memory_space<vmem>>, %arg9: memref<1x128xf32, #tpu.memory_space<vmem>>, %arg10: memref<1x128x128xf32, #tpu.memory_space<vmem>>, %arg11: memref<256x128xbf16, #tpu.memory_space<vmem>>, %arg12: memref<128x128xbf16, #tpu.memory_space<vmem>>, %arg13: memref<128x128xbf16, #tpu.memory_space<vmem>>) attributes {dimension_semantics = [#tpu.dimension_semantics<parallel>, #tpu.dimension_semantics<arbitrary>], iteration_bounds = array<i64: 2, 2>, scalar_prefetch = 0 : i64, scratch_operands = 3 : i64, tpu.core_type = #tpu.core_type<tc>, window_params = [{transform_indices = @transform_0, window_bounds = array<i64: 1, 256, 128>}, {pipeline_mode = #tpu.pipeline_mode<synchronous>, transform_indices = @transform_1, window_bounds = array<i64: 128, 384>}, {pipeline_mode = #tpu.pipeline_mode<synchronous>, transform_indices = @transform_2, window_bounds = array<i64: 1, 384>}, {pipeline_mode = #tpu.pipeline_mode<synchronous>, transform_indices = @transform_3, window_bounds = array<i64: 128, 256>}, {pipeline_mode = #tpu.pipeline_mode<synchronous>, transform_indices = @transform_4, window_bounds = array<i64: 128, 1>}, {pipeline_mode = #tpu.pipeline_mode<synchronous>, transform_indices = @transform_5, window_bounds = array<i64: 128, 128>}, {pipeline_mode = #tpu.pipeline_mode<synchronous>, transform_indices = @transform_6, window_bounds = array<i64: 128, 128>}, {pipeline_mode = #tpu.pipeline_mode<synchronous>, transform_indices = @transform_7, window_bounds = array<i64: 1, 128>}, {transform_indices = @transform_8, window_bounds = array<i64: 1, 128, 128>}]} {
    %c0_i32 = arith.constant 0 : i32
    %0 = arith.cmpi eq, %arg1, %c0_i32 : i32
    %1 = arith.extui %0 : i1 to i32
    %c0_i32_0 = arith.constant 0 : i32
    %2 = arith.cmpi ne, %1, %c0_i32_0 : i32
    scf.if %2 {
      %c0_18 = arith.constant 0 : index
      %c0_19 = arith.constant 0 : index
      %c0_20 = arith.constant 0 : index
      %31 = vector.load %arg2[%c0_18, %c0_19, %c0_20] : memref<1x256x128xf32, #tpu.memory_space<vmem>>, vector<1x256x128xf32>
      %32 = vector.shape_cast %31 : vector<1x256x128xf32> to vector<256x128xf32>
      %33 = arith.truncf %32 : vector<256x128xf32> to vector<256x128xbf16>
      %c0_21 = arith.constant 0 : index
      %c0_22 = arith.constant 0 : index
      %34 = vector.load %arg3[%c0_21, %c0_22] : memref<128x384xbf16, #tpu.memory_space<vmem>>, vector<128x384xbf16>
      %cst_23 = arith.constant dense<0.000000e+00> : vector<256x384xf32>
      %35 = tpu.matmul %33, %34, %cst_23 {dimension_numbers = #tpu.dot_dimension_numbers<[1], [0], [0], [1], [0, 0, 1, 1], [], []>} : vector<256x128xbf16>, vector<128x384xbf16>, vector<256x384xf32> -> vector<256x384xf32>
      %c0_24 = arith.constant 0 : index
      %c0_25 = arith.constant 0 : index
      %36 = vector.load %arg4[%c0_24, %c0_25] : memref<1x384xf32, #tpu.memory_space<vmem>>, vector<1x384xf32>
      %37 = vector.broadcast %36 : vector<1x384xf32> to vector<256x384xf32>
      %38 = arith.addf %35, %37 : vector<256x384xf32>
      %39 = vector.extract_strided_slice %38 {offsets = [0, 0], sizes = [256, 128], strides = [1, 1]} : vector<256x384xf32> to vector<256x128xf32>
      %40 = arith.truncf %39 : vector<256x128xf32> to vector<256x128xbf16>
      %c0_26 = arith.constant 0 : index
      %c0_27 = arith.constant 0 : index
      %41 = vector.load %arg11[%c0_26, %c0_27] : memref<256x128xbf16, #tpu.memory_space<vmem>>, vector<256x128xbf16>
      tpu.vector_store %arg11[%c0_26, %c0_27], %40 {strides = array<i32>} : memref<256x128xbf16, #tpu.memory_space<vmem>>, vector<256x128xbf16>,
      %42 = vector.extract_strided_slice %38 {offsets = [0, 128], sizes = [256, 256], strides = [1, 1]} : vector<256x384xf32> to vector<256x256xf32>
      %43 = arith.truncf %42 : vector<256x256xf32> to vector<256x256xbf16>
      %c0_28 = arith.constant 0 : index
      %c0_29 = arith.constant 0 : index
      %44 = vector.load %arg5[%c0_28, %c0_29] : memref<128x256xbf16, #tpu.memory_space<vmem>>, vector<128x256xbf16>
      %cst_30 = arith.constant dense<0.000000e+00> : vector<128x256xf32>
      %45 = tpu.matmul %44, %43, %cst_30 {dimension_numbers = #tpu.dot_dimension_numbers<[1], [0], [0], [1], [0, 0, 1, 1], [], []>} : vector<128x256xbf16>, vector<256x256xbf16>, vector<128x256xf32> -> vector<128x256xf32>
      %c0_31 = arith.constant 0 : index
      %c0_32 = arith.constant 0 : index
      %46 = vector.load %arg6[%c0_31, %c0_32] : memref<128x1xf32, #tpu.memory_space<vmem>>, vector<128x1xf32>
      %47 = vector.broadcast %46 : vector<128x1xf32> to vector<128x256xf32>
      %48 = arith.addf %45, %47 : vector<128x256xf32>
      %c0_33 = arith.constant 0 : index
      %c0_34 = arith.constant 0 : index
      %49 = vector.load %arg7[%c0_33, %c0_34] : memref<128x128xbf16, #tpu.memory_space<vmem>>, vector<128x128xbf16>
      %50 = vector.extract_strided_slice %48 {offsets = [0, 0], sizes = [128, 128], strides = [1, 1]} : vector<128x256xf32> to vector<128x128xf32>
      %51 = arith.truncf %50 : vector<128x128xf32> to vector<128x128xbf16>
      %52 = arith.mulf %51, %49 : vector<128x128xbf16>
      %c0_35 = arith.constant 0 : index
      %c0_36 = arith.constant 0 : index
      %53 = vector.load %arg12[%c0_35, %c0_36] : memref<128x128xbf16, #tpu.memory_space<vmem>>, vector<128x128xbf16>
      tpu.vector_store %arg12[%c0_35, %c0_36], %52 {strides = array<i32>} : memref<128x128xbf16, #tpu.memory_space<vmem>>, vector<128x128xbf16>,
      %54 = vector.extract_strided_slice %48 {offsets = [0, 128], sizes = [128, 128], strides = [1, 1]} : vector<128x256xf32> to vector<128x128xf32>
      %55 = arith.truncf %54 : vector<128x128xf32> to vector<128x128xbf16>
      %56 = arith.mulf %55, %49 : vector<128x128xbf16>
      %c0_37 = arith.constant 0 : index
      %c0_38 = arith.constant 0 : index
      %57 = vector.load %arg13[%c0_37, %c0_38] : memref<128x128xbf16, #tpu.memory_space<vmem>>, vector<128x128xbf16>
      tpu.vector_store %arg13[%c0_37, %c0_38], %56 {strides = array<i32>} : memref<128x128xbf16, #tpu.memory_space<vmem>>, vector<128x128xbf16>,
    } else {
    }
    %c128_i32 = arith.constant 128 : i32
    %3 = arith.muli %arg1, %c128_i32 : i32
    %4 = tpu.assume_multiple %3, 128 : i32
    %5 = arith.index_cast %4 : i32 to index
    %c0 = arith.constant 0 : index
    %6 = vector.load %arg11[%5, %c0] : memref<256x128xbf16, #tpu.memory_space<vmem>>, vector<128x128xbf16>
    %c0_1 = arith.constant 0 : index
    %c0_2 = arith.constant 0 : index
    %7 = vector.load %arg12[%c0_1, %c0_2] : memref<128x128xbf16, #tpu.memory_space<vmem>>, vector<128x128xbf16>
    %cst = arith.constant dense<0.000000e+00> : vector<128x128xf32>
    %8 = tpu.matmul %6, %7, %cst {dimension_numbers = #tpu.dot_dimension_numbers<[1], [1], [0], [0], [0, 0, 1, 0], [], []>} : vector<128x128xbf16>, vector<128x128xbf16>, vector<128x128xf32> -> vector<128x128xf32>
    %cst_3 = arith.constant dense<0xFF800000> : vector<128xf32>
    %9 = vector.multi_reduction <maximumf>, %8, %cst_3 [1] : vector<128x128xf32> to vector<128xf32>
    %10 = vector.shape_cast %9 : vector<128xf32> to vector<128x1xf32>
    %11 = vector.broadcast %10 : vector<128x1xf32> to vector<128x128xf32>
    %12 = arith.subf %8, %11 : vector<128x128xf32>
    %13 = math.exp %12 : vector<128x128xf32>
    %14 = arith.truncf %13 : vector<128x128xf32> to vector<128x128xbf16>
    %c0_4 = arith.constant 0 : index
    %c0_5 = arith.constant 0 : index
    %15 = vector.load %arg7[%c0_4, %c0_5] : memref<128x128xbf16, #tpu.memory_space<vmem>>, vector<128x128xbf16>
    %cst_6 = arith.constant dense<0.000000e+00> : vector<128x128xf32>
    %16 = tpu.matmul %14, %15, %cst_6 {dimension_numbers = #tpu.dot_dimension_numbers<[1], [0], [0], [1], [0, 0, 1, 1], [], []>} : vector<128x128xbf16>, vector<128x128xbf16>, vector<128x128xf32> -> vector<128x128xf32>
    %17 = tpu.reciprocal %16 {approx = true} : vector<128x128xf32> -> vector<128x128xf32>
    %18 = arith.mulf %13, %17 : vector<128x128xf32>
    %19 = arith.truncf %18 : vector<128x128xf32> to vector<128x128xbf16>
    %c0_7 = arith.constant 0 : index
    %c0_8 = arith.constant 0 : index
    %20 = vector.load %arg13[%c0_7, %c0_8] : memref<128x128xbf16, #tpu.memory_space<vmem>>, vector<128x128xbf16>
    %cst_9 = arith.constant dense<0.000000e+00> : vector<128x128xf32>
    %21 = tpu.matmul %19, %20, %cst_9 {dimension_numbers = #tpu.dot_dimension_numbers<[1], [0], [0], [1], [0, 0, 1, 1], [], []>} : vector<128x128xbf16>, vector<128x128xbf16>, vector<128x128xf32> -> vector<128x128xf32>
    %22 = arith.truncf %21 : vector<128x128xf32> to vector<128x128xbf16>
    %c0_10 = arith.constant 0 : index
    %c0_11 = arith.constant 0 : index
    %23 = vector.load %arg8[%c0_10, %c0_11] : memref<128x128xbf16, #tpu.memory_space<vmem>>, vector<128x128xbf16>
    %cst_12 = arith.constant dense<0.000000e+00> : vector<128x128xf32>
    %24 = tpu.matmul %22, %23, %cst_12 {dimension_numbers = #tpu.dot_dimension_numbers<[1], [0], [0], [1], [0, 0, 1, 1], [], []>} : vector<128x128xbf16>, vector<128x128xbf16>, vector<128x128xf32> -> vector<128x128xf32>
    %c0_13 = arith.constant 0 : index
    %c0_14 = arith.constant 0 : index
    %25 = vector.load %arg9[%c0_13, %c0_14] : memref<1x128xf32, #tpu.memory_space<vmem>>, vector<1x128xf32>
    %26 = vector.broadcast %25 : vector<1x128xf32> to vector<128x128xf32>
    %27 = arith.addf %24, %26 : vector<128x128xf32>
    %c0_15 = arith.constant 0 : index
    %c0_16 = arith.constant 0 : index
    %c0_17 = arith.constant 0 : index
    %28 = vector.load %arg10[%c0_15, %c0_16, %c0_17] : memref<1x128x128xf32, #tpu.memory_space<vmem>>, vector<1x128x128xf32>
    %29 = vector.shape_cast %28 : vector<1x128x128xf32> to vector<128x128xf32>
    %30 = vector.shape_cast %27 : vector<128x128xf32> to vector<1x128x128xf32>
    tpu.vector_store %arg10[%c0_15, %c0_16, %c0_17], %30 {strides = array<i32>} : memref<1x128x128xf32, #tpu.memory_space<vmem>>, vector<1x128x128xf32>,
    return
  }
  func.func @transform_0(%arg0: i32, %arg1: i32) -> (i32, i32, i32) {
    %c0_i32 = arith.constant 0 : i32
    %c0_i32_0 = arith.constant 0 : i32
    %c0_i32_1 = arith.constant 0 : i32
    return %arg0, %c0_i32, %c0_i32_0 : i32, i32, i32
  }
  func.func @transform_1(%arg0: i32, %arg1: i32) -> (i32, i32) {
    %c0_i32 = arith.constant 0 : i32
    %c0_i32_0 = arith.constant 0 : i32
    %c0_i32_1 = arith.constant 0 : i32
    return %c0_i32, %c0_i32_0 : i32, i32
  }
  func.func @transform_2(%arg0: i32, %arg1: i32) -> (i32, i32) {
    %c0_i32 = arith.constant 0 : i32
    %c0_i32_0 = arith.constant 0 : i32
    %c0_i32_1 = arith.constant 0 : i32
    return %c0_i32, %c0_i32_0 : i32, i32
  }
  func.func @transform_3(%arg0: i32, %arg1: i32) -> (i32, i32) {
    %c0_i32 = arith.constant 0 : i32
    %c0_i32_0 = arith.constant 0 : i32
    %c0_i32_1 = arith.constant 0 : i32
    return %c0_i32, %c0_i32_0 : i32, i32
  }
  func.func @transform_4(%arg0: i32, %arg1: i32) -> (i32, i32) {
    %c0_i32 = arith.constant 0 : i32
    %c0_i32_0 = arith.constant 0 : i32
    %c0_i32_1 = arith.constant 0 : i32
    return %c0_i32, %c0_i32_0 : i32, i32
  }
  func.func @transform_5(%arg0: i32, %arg1: i32) -> (i32, i32) {
    %c0_i32 = arith.constant 0 : i32
    %c0_i32_0 = arith.constant 0 : i32
    %c0_i32_1 = arith.constant 0 : i32
    return %c0_i32, %c0_i32_0 : i32, i32
  }
  func.func @transform_6(%arg0: i32, %arg1: i32) -> (i32, i32) {
    %c0_i32 = arith.constant 0 : i32
    %c0_i32_0 = arith.constant 0 : i32
    %c0_i32_1 = arith.constant 0 : i32
    return %c0_i32, %c0_i32_0 : i32, i32
  }
  func.func @transform_7(%arg0: i32, %arg1: i32) -> (i32, i32) {
    %c0_i32 = arith.constant 0 : i32
    %c0_i32_0 = arith.constant 0 : i32
    %c0_i32_1 = arith.constant 0 : i32
    return %c0_i32, %c0_i32_0 : i32, i32
  }
  func.func @transform_8(%arg0: i32, %arg1: i32) -> (i32, i32, i32) {
    %c0_i32 = arith.constant 0 : i32
    %c0_i32_0 = arith.constant 0 : i32
    return %arg0, %arg1, %c0_i32 : i32, i32, i32
  }
}

</mosaic_0001>

<bundles_post_ra>
// kernel: tpu_custom_call.1
= control target key start
LH: loop header
LB: loop body
LE: loop exit
PB: predicated region body
PF: predicated region fallthrough
CT: control target
= control target key end

     0   :  { %s4087_s0 = inlined_call_operand.hbm [shape: f32[2,256,128], index: 0, kind: input, shape index: {}]   ;;  %s4088_s1 = inlined_call_operand.hbm [shape: bf16[128,384], index: 1, kind: input, shape index: {}]   ;;  %s4089_s2 = inlined_call_operand.vmem [shape: f32[1,384], index: 2, kind: input, shape index: {}]   ;;  %s4090_s3 = inlined_call_operand.vmem [shape: bf16[128,256], index: 3, kind: input, shape index: {}]   ;;  %s4091_s4 = inlined_call_operand.vmem [shape: f32[128,1], index: 4, kind: input, shape index: {}]   ;;  %s4092_s5 = inlined_call_operand.hbm [shape: bf16[128,128], index: 5, kind: input, shape index: {}]   ;;  %s4093_s6 = inlined_call_operand.hbm [shape: bf16[128,128], index: 6, kind: input, shape index: {}]   ;;  %s4094_s7 = inlined_call_operand.vmem [shape: f32[1,128], index: 7, kind: input, shape index: {}]   ;;  %s4095_s8 = inlined_call_operand.hbm [shape: f32[2,256,128], index: 8, kind: output, shape index: {}]  }
   0x1   :  { %4108 = sst [smem:[#allocation22_spill]] %s4088_s1 }
   0x2   :  { %4109 = sst [smem:[#allocation23_spill]] %s4090_s3 }
   0x3   :  { %4110 = sst [smem:[#allocation24_spill]] %s4091_s4 }
   0x4   :  { %4111 = sst [smem:[#allocation25_spill]] %s4092_s5 }
   0x5   :  { %4112 = sst [smem:[#allocation26_spill]] %s4093_s6 }
   0x6   :  { %4113 = sst [smem:[#allocation27_spill]] %s4094_s7 }
   0x7   :  { %4114 = sst [smem:[#allocation28_spill]] %s4095_s8 }
   0x8   :  { %13 = vsyncpa [#allocation6], 0 }
   0x9   :  { %15 = vsyncpa [#allocation6 + $0x1], 0 }
   0xa   :  { %16 = vsyncpa [#allocation9], 0 }
   0xb   :  { %17 = vsyncpa [#allocation12], 0 }
   0xc   :  { %18 = vsyncpa [#allocation7], 0 }
   0xd   :  { %20 = vsyncpa [#allocation7 + $0x1], 0  ;;  %s3250_s27 = smov 0   ;;  %s3252_s28 = smov 0  }
   0xe   :  { %s3254_s29 = smov 0   ;;  %s3256_s30 = smov 0  }
   0xf   :  { %s3258_s9 = smov 0   ;;  %s3260_s10 = smov 0  }
  0x10   :  { %s3262_s11 = smov 0   ;;  %s3264_s12 = smov 0  }
  0x11   :  { %s3266_s13 = smov 0   ;;  %s3268_s14 = smov 0  }
  0x12   :  { %s3270_s15 = smov 0  }
  0x13 LB: > { %4115 = sst [smem:[#allocation18_spill]] %s3149_s27  ;;  %s2286_s16 = sadd.s32 4294967295, %s3189_s15   ;;  %s3189_s15 = sphi %s3270_s15, %s26_s15   ;;  %s3185_s14 = sphi %s3268_s14, %s4155_s14   ;;  %s3181_s13 = sphi %s3266_s13, %s4154_s13   ;;  %s3177_s12 = sphi %s3264_s12, %s4153_s12   ;;  %s3173_s11 = sphi %s3262_s11, %s4152_s11   ;;  %s3169_s10 = sphi %s3260_s10, %s4151_s10   ;;  %s3165_s9 = sphi %s3258_s9, %s4150_s9   ;;  %s3161_s30 = sphi %s3256_s30, %s4149_s30   ;;  %s3157_s29 = sphi %s3254_s29, %s4148_s29   ;;  %s3153_s28 = sphi %s3252_s28, %s4147_s28   ;;  %s3149_s27 = sphi %s3250_s27, %s4146_s27  }
  0x14   : > { %4116 = sst [smem:[#allocation19_spill]] %s3177_s12  ;;  %s2287_s17 = sadd.s32 4294967294, %s3189_s15  }
  0x15   : > { %p58_p0 = scmp.ne.s32.totalorder %s3165_s9, %s3161_s30  ;;  %p3306_p1 = scmp.eq.s32.totalorder %s2286_s16, 0 }
  0x16   : > { %p230_p2 = scmp.ne.s32.totalorder %s3157_s29, %s3153_s28  ;;  %p231_p4 = scmp.eq.s32.totalorder %s2286_s16, 3 }
  0x17   : > { %s4117_s18 = scalar_select %p3306_p1, 1, 0 }
  0x18   : > { %p3315_p3 = por %p3306_p1, %p58_p0  ;;  %p236_p5 = scmp.ne.s32.totalorder %s3153_s28, %s3149_s27 }
  0x19   : > { %p237_p6 = scmp.eq.s32.totalorder %s2287_s17, 3  ;;  %p3321_p7 = por %p231_p4, %p230_p2 }
  0x1a   : > { %s4118_s20 = scalar_select %p3315_p3, 1, 0 }
  0x1b   : > { %s4119_s21 = scalar_select %p3321_p7, 1, 0 }
  0x1c   : > { %p2288_p8 = scmp.ge.s32.totalorder %s3189_s15, 1  ;;  %p3326_p9 = por %p237_p6, %p236_p5 }
  0x1d   : > { %4120 = sst [smem:[#allocation20_spill]] %s4119_s21  ;;  %p244_p10 = scmp.lt.s32.totalorder %s3189_s15, 5 }
  0x1e   : > { %s4121_s22 = scalar_select %p3326_p9, 1, 0 }
  0x1f   : > { %p3331_p11 = pnand %p2288_p8, %p244_p10  ;;  %s3191_s24 = smov [#allocation8]  }
  0x20   : > { %4122 = sst [smem:[#allocation21_spill]] %s4121_s22  ;;  %s256_s25 = sshll.u32 %s3191_s24, 4  ;;  %s257_s25 = int_to_ptr.vmem [resolvable:$true] %s256_s25 }
  0x21   : > { %s4123_s23 = scalar_select %p3331_p11, 1, 0 }
  0x22   : > { %p2673_p12 = pneg %p3331_p11  ;;  %s3192_s30 = smov [#allocation10]  }
  0x23   : > { %s278_s16 = sshll.u32 %s3192_s30, 4  ;;  %s4125_s1 = sld [smem:[#allocation22_spill]]  ;;  %s3343_s16 = int_to_ptr.vmem [resolvable:$true] %s278_s16 }
  0x24   : > { %p3339_p13 = pnand %p2673_p12, %p3306_p1 }
  0x26   : > { %p3353_p2 = pneg %p3339_p13 }
  0x29   : > { %s2945_s22 = scalar_lea.hbm %s4125_s1, 3072 }
  0x2a   : > { %p2946_p0 = scmp.ne.s32.totalorder %s4125_s1, %s2945_s22  ;;  %p2952_p6 = scmp.lt.u32.totalorder %s2945_s22, %s4125_s1 }
  0x2c   : > { %p2948_p4 = pnand %p3353_p2, %p2946_p0 }
  0x2e   : > { %p2949_p5 = pneg %p2948_p4 }
  0x30   : > { %p2954_p8 = pnand %p2952_p6, %p2949_p5 }
  0x32   : > { %2957 = shalt.err (!%p2954_p8)
}
  0x33   : > { %s2958_s19 = scalar_lea.vmem %s257_s25, 3072  ;;  %p2966_p7 = scmp.lt.s32.totalorder %s257_s25, %s257_s25 }
  0x34   : > { %p2959_p10 = scmp.ne.s32.totalorder %s257_s25, %s2958_s19  ;;  %p2967_p1 = scmp.lt.s32.totalorder %s2958_s19, %s2958_s19 }
  0x36   : > { %p2961_p12 = pnand %p2959_p10, %p3353_p2  ;;  %p2968_p3 = por %p2967_p1, %p2966_p7 }
  0x38   : > { %p2962_p9 = pneg %p2961_p12 }
  0x3a   : > { %p2969_p11 = pnand %p2968_p3, %p2962_p9 }
  0x3c   : > { %2972 = shalt.err (!%p2969_p11)
}
  0x3d   : > { %s3193_s8 = smov 192   ;;  %s3194_s27 = smov 12  }
  0x3e   : > { %2676 = dma.hbm_to_vmem [thread:$0]  (!%p3339_p13), %s4125_s1, 3072, %s257_s25, [#allocation9], %s3193_s8, %s3193_s8, %s3194_s27  }
  0x3f   : > { %s4127_s5 = sld [smem:[#allocation25_spill]] }
  0x45   : > { %s2973_s12 = scalar_lea.hbm %s4127_s5, 1024 }
  0x46   : > { %p2974_p0 = scmp.ne.s32.totalorder %s4127_s5, %s2973_s12  ;;  %p2980_p7 = scmp.lt.u32.totalorder %s2973_s12, %s4127_s5 }
  0x48   : > { %p2976_p1 = pnand %p2974_p0, %p3353_p2 }
  0x4a   : > { %p2977_p3 = pneg %p2976_p1 }
  0x4c   : > { %p2982_p9 = pnand %p2980_p7, %p2977_p3 }
  0x4e   : > { %2985 = shalt.err (!%p2982_p9)
}
  0x4f   : > { %s2986_s25 = scalar_lea.vmem %s3343_s16, 1024  ;;  %p2994_p6 = scmp.lt.s32.totalorder %s3343_s16, %s3343_s16 }
  0x50   : > { %p2987_p11 = scmp.ne.s32.totalorder %s3343_s16, %s2986_s25  ;;  %p2995_p8 = scmp.lt.s32.totalorder %s2986_s25, %s2986_s25 }
  0x52   : > { %p2989_p4 = pnand %p2987_p11, %p3353_p2  ;;  %p2996_p10 = por %p2995_p8, %p2994_p6 }
  0x54   : > { %p2990_p5 = pneg %p2989_p4 }
  0x56   : > { %p2997_p12 = pnand %p2996_p10, %p2990_p5 }
  0x58   : > { %3000 = shalt.err (!%p2997_p12)
}
  0x59   : > { %s3195_s4 = smov 64   ;;  %s3196_s3 = smov 4  }
  0x5a   : > { %2679 = dma.hbm_to_vmem [thread:$0]  (!%p3339_p13), %s4127_s5, 1024, %s3343_s16, [#allocation9], %s3195_s4, %s3195_s4, %s3196_s3  }
  0x5b   : > { %s3197_s8 = smov [#allocation11]   ;;  %s4128_s6 = sld [smem:[#allocation26_spill]] }
  0x5c   : > { %s291_s27 = sshll.u32 %s3197_s8, 4  ;;  %s292_s27 = int_to_ptr.vmem [resolvable:$true] %s291_s27 }
  0x61   : > { %s3001_s17 = scalar_lea.hbm %s4128_s6, 1024 }
  0x62   : > { %p3002_p0 = scmp.ne.s32.totalorder %s4128_s6, %s3001_s17  ;;  %p3008_p7 = scmp.lt.u32.totalorder %s3001_s17, %s4128_s6 }
  0x64   : > { %p3004_p1 = pnand %p3002_p0, %p3353_p2 }
  0x66   : > { %p3005_p3 = pneg %p3004_p1 }
  0x68   : > { %p3010_p9 = pnand %p3008_p7, %p3005_p3 }
  0x6a   : > { %3013 = shalt.err (!%p3010_p9)
}
  0x6b   : > { %s3014_s16 = scalar_lea.vmem %s292_s27, 1024  ;;  %p3022_p6 = scmp.lt.s32.totalorder %s292_s27, %s292_s27 }
  0x6c   : > { %p3015_p11 = scmp.ne.s32.totalorder %s292_s27, %s3014_s16  ;;  %p3023_p8 = scmp.lt.s32.totalorder %s3014_s16, %s3014_s16 }
  0x6e   : > { %p3017_p4 = pnand %p3015_p11, %p3353_p2  ;;  %p3024_p10 = por %p3023_p8, %p3022_p6 }
  0x70   : > { %p3018_p5 = pneg %p3017_p4 }
  0x72   : > { %p3025_p12 = pnand %p3024_p10, %p3018_p5 }
  0x74   : > { %3028 = shalt.err (!%p3025_p12)
}
  0x75   : > { %2682 = dma.hbm_to_vmem [thread:$0]  (!%p3339_p13), %s4128_s6, 1024, %s292_s27, [#allocation12], %s3195_s4, %s3195_s4, %s3196_s3  }
  0x76   : > { %s35_s1 = sadd.s32 1, %s3181_s13  ;;  %s38_s24 = sadd.s32 1, %s3185_s14 }
  0x77   : > { %p36_p2 = scmp.ge.s32.totalorder %s35_s1, 2  ;;  %s45_s8 = sadd.s32 1, %s3169_s10 }
  0x78   : > { %p52_p0 = scmp.ne.s32.totalorder %s3169_s10, %s3165_s9  ;;  %p53_p1 = scmp.eq.s32.totalorder %s3189_s15, 0 }
  0x79   : > { %s4157_s1 = smov (%p36_p2, %s35_s1), 0  ;;  %s4159_s24 = smov (!%p36_p2, %s38_s24), %s3185_s14 }
  0x7a   : > { %s216_s26 = ssub.s32 %s3181_s13, %s4157_s1  ;;  %p40_p3 = scmp.ge.s32.totalorder %s4159_s24, 2 }
  0x7b   : > { %p2694_p7 = scmp.lt.s32.totalorder %s3189_s15, 4  ;;  %p3422_p13 = por %p53_p1, %p52_p0 }
  0x7c   : > { %s308_s3 = sand.u32 1, %s3169_s10   ;;  %s4161_s24 = smov (%p40_p3, %s4159_s24), 0 }
  0x7d   : > { %s2293_s27 = sshll.u32 %s308_s3, 8  ;;  %s42_s21 = ssub.s32 %s3185_s14, %s4161_s24 }
  0x7e   : > { %p43_p9 = scmp.eq.s32.totalorder %s42_s21, 0  ;;  %s217_s22 = sor.u32 %s216_s26, %s42_s21 }
  0x7f   : > { %p218_p11 = scmp.eq.s32.totalorder %s217_s22, 0  ;;  %s2376_s17 = sshll.u32 %s3185_s14, 12 }
  0x80   : > { %s3433_s30 = scalar_select %p43_p9, %s3169_s10, %s45_s8  }
  0x81   : > { %s4130_s19 = sadd.s32 1, %s3157_s29  ;;  %s3443_s12 = scalar_lea.hbm %s4087_s0, %s2376_s17 }
  0x82   : > { %s3438_s25 = scalar_select %p218_p11, %s3157_s29, %s4130_s19  }
  0x83   : > { %s312_s5 = scalar_lea.vmem [#allocation5], %s2293_s27  ;;  %p3451_p4 = pnand %p2694_p7, %p3422_p13 }
  0x84   : > { %s319_s6 = sshll.u32 %s312_s5, 4  ;;  %s3455_s26 = scalar_lea.sflag [#allocation6], %s308_s3  ;;  %s3445_s6 = int_to_ptr.vmem [resolvable:$true] %s319_s6 }
  0x85   : > { %s3029_s21 = scalar_lea.hbm %s3443_s12, 4096  ;;  %p3031_p6 = pneg %p3451_p4 }
  0x86   : > { %p3030_p5 = scmp.ne.s32.totalorder %s3443_s12, %s3029_s21  ;;  %s3034_s4 = scalar_lea.hbm %s4087_s0, 8192 }
  0x87   : > { %p3035_p12 = scmp.lt.u32.totalorder %s3443_s12, %s4087_s0  ;;  %p3036_p2 = scmp.lt.u32.totalorder %s3034_s4, %s3029_s21 }
  0x88   : > { %p3032_p8 = pnand %p3031_p6, %p3030_p5  ;;  %p3038_p1 = scmp.lt.u32.totalorder %s3029_s21, %s3443_s12 }
  0x89   : > { %p3037_p0 = por %p3036_p2, %p3035_p12 }
  0x8a   : > { %p3033_p10 = pneg %p3032_p8 }
  0x8b   : > { %p3039_p3 = por %p3038_p1, %p3037_p0 }
  0x8d   : > { %p3040_p7 = pnand %p3039_p3, %p3033_p10 }
  0x8f   : > { %3043 = shalt.err (!%p3040_p7)
}
  0x90   : > { %s3044_s3 = scalar_lea.vmem %s3445_s6, 4096  ;;  %s3198_s19 = smov [#allocation5]  }
  0x91   : > { %p3045_p13 = scmp.ne.s32.totalorder %s3445_s6, %s3044_s3  ;;  %s3049_s16 = sshll.u32 %s3198_s19, 4  ;;  %s3050_s16 = int_to_ptr.vmem [resolvable:$false] %s3049_s16 }
  0x92   : > { %s3051_s7 = scalar_lea.vmem %s3050_s16, 8192  ;;  %p3052_p5 = scmp.lt.s32.totalorder %s3445_s6, %s3050_s16 }
  0x93   : > { %p3047_p9 = pnand %p3045_p13, %p3031_p6  ;;  %p3053_p8 = scmp.lt.s32.totalorder %s3051_s7, %s3044_s3 }
  0x95   : > { %p3048_p11 = pneg %p3047_p9  ;;  %p3054_p12 = por %p3053_p8, %p3052_p5 }
  0x97   : > { %p3055_p2 = pnand %p3054_p12, %p3048_p11 }
  0x99   : > { %3058 = shalt.err (!%p3055_p2)
}
  0x9a   : > { %s3199_s21 = smov 128   ;;  %s3200_s5 = smov 8  }
  0x9b   : > { %2686 = dma.hbm_to_vmem [thread:$0]  (!%p3451_p4), %s3443_s12, 4096, %s3445_s6, %s3455_s26, %s3199_s21, %s3199_s21, %s3200_s5  }
  0x9c   : > { %p4132_p6 = scmp.ne.s32.totalorder %s4123_s23, 0 }
  0x9d   : > { %s333_s27 = sand.u32 (!%p4132_p6), 1, %s3165_s9   ;;  %p4133_p10 = scmp.ne.s32.totalorder (!%p4132_p6), %s4118_s20, 0 }
  0x9e   : > { %331 = sbr.rel (%p4132_p6) target bundleno = 1974 (0x7b6), region = 52  ;;  %s2297_s4 = sshll.u32 (!%p4132_p6), %s333_s27, 8 }
  0x9f   : > { %s334_s22 = scalar_lea.sflag (!%p4132_p6), [#allocation6], %s333_s27  ;;  %s3486_s17 = scalar_lea.vmem (!%p4132_p6), [#allocation5], %s2297_s4 }
  0xa5   : > { %3132 = dma.done.wait (%p4133_p10), %s334_s22, 4096  }
  0xa6   : > { %3134 = vsyncadd (%p4133_p10), %s334_s22, 4294963200  ;;  %p4134_p0 = scmp.ne.s32.totalorder %s4117_s18, 0 }
  0xa8   : > { %3136 = dma.done.wait (%p4134_p0), [#allocation9], 4096  }
  0xa9   : > { %3138 = vsyncadd (%p4134_p0), [#allocation9], 4294963200 }
  0xaa   : > { %3140 = dma.done.wait (%p4134_p0), [#allocation12], 1024  }
  0xab   : > { %3142 = vsyncadd (%p4134_p0), [#allocation12], 4294966272  ;;  %s379_s6 = sand.u32 1, %s3153_s28   ;;  %p2302_p4 = scmp.ne.s32.totalorder %s3173_s11, 0 }
  0xac   : > { %s2301_s23 = sshll.u32 %s379_s6, 7  ;;  %v2801_v0 = vld [vmem:[#allocation8 + $0x4] ss:$12 sps:$4 sm:$0xff] (!%p2302_p4)   ;;  %v2803_v1 = vld [vmem:[#allocation8 + $0x8] ss:$12 sps:$4 sm:$0xff] (!%p2302_p4)   ;;  %v3201_v2 = vmov (!%p2302_p4), 0  }
  0xad   : > { %s3503_s12 = scalar_lea.vmem [#allocation13], %s2301_s23  ;;  %387 = sbr.rel (%p2302_p4) target bundleno = 826 (0x33a), region = 72  ;;  %645 = vmatprep.mubr.bf16.mxu0 (!%p2302_p4), %v3201_v2  ;;  %2799 = vset.pattern.permute.xlu0 (!%p2302_p4), %v3201_v2  ;;  %v2804_v3 = vld [vmem:[#allocation8] ss:$12 sps:$4 sm:$0xff] (!%p2302_p4)   ;;  %v2805_v4 = vld [vmem:[#allocation8 + $0x1c] ss:$12 sps:$4 sm:$0xff] (!%p2302_p4)  }
  0xae   : > { %613 = vmatprep.subr.bf16.mxu0 (!%p2302_p4), %v2801_v0  ;;  %2800 = vset.pattern.permute.xlu1 (!%p2302_p4), %v3201_v2  ;;  %v2807_v5 = vld [vmem:[#allocation8 + $0x20] ss:$12 sps:$4 sm:$0xff] (!%p2302_p4)   ;;  %v2808_v6 = vld [vmem:[#allocation8 + $0x18] ss:$12 sps:$4 sm:$0xff] (!%p2302_p4)   ;;  %v2812_v9 = vld [vmem:[#allocation8 + $0x30] ss:$12 sps:$4 sm:$0xff] (!%p2302_p4)  }
  0xaf   : > { %2465 = vmatprep.subr.bf16.mxu1 (!%p2302_p4), %v2803_v1  ;;  %614 = vmatpush1.bf16.msra.mxu0 (!%p2302_p4), %v2804_v3  ;;  %v2809_v7 = vld [vmem:[#allocation8 + $0x34] ss:$12 sps:$4 sm:$0xff] (!%p2302_p4)   ;;  %v2811_v8 = vld [vmem:[#allocation8 + $0x38] ss:$12 sps:$4 sm:$0xff] (!%p2302_p4)   ;;  %v2815_v11 = vld [vmem:[#allocation8 + $0x50] ss:$12 sps:$4 sm:$0xff] (!%p2302_p4)  }
  0xb0   : > { %2466 = vmatpush3.bf16.msra.mxu1 (!%p2302_p4), %v2803_v1  ;;  %615 = vmatprep.subr.bf16.mxu0 (!%p2302_p4), %v2805_v4  ;;  %v2813_v10 = vld [vmem:[#allocation8 + $0x4c] ss:$12 sps:$4 sm:$0xff] (!%p2302_p4)   ;;  %v2816_v12 = vld [vmem:[#allocation8 + $0x48] ss:$12 sps:$4 sm:$0xff] (!%p2302_p4)   ;;  %v2817_v13 = vld [vmem:[#allocation8 + $0x64] ss:$12 sps:$4 sm:$0xff] (!%p2302_p4)  }
  0xb1   : > { %2467 = vmatprep.subr.bf16.mxu1 (!%p2302_p4), %v2807_v5  ;;  %v2819_v14 = vld [vmem:[#allocation8 + $0x68] ss:$12 sps:$4 sm:$0xff] (!%p2302_p4)   ;;  %v2820_v15 = vld [vmem:[#allocation8 + $0x60] ss:$12 sps:$4 sm:$0xff] (!%p2302_p4)   ;;  %v2824_v20 = vld [vmem:[#allocation8 + $0x78] ss:$12 sps:$4 sm:$0xff] (!%p2302_p4)  }
  0xb2   : > { %v2821_v16 = vld [vmem:[#allocation8 + $0x7c] ss:$12 sps:$4 sm:$0xff] (!%p2302_p4)   ;;  %v2823_v17 = vld [vmem:[#allocation8 + $0x80] ss:$12 sps:$4 sm:$0xff] (!%p2302_p4)   ;;  %v2827_v23 = vld [vmem:[#allocation8 + $0x98] ss:$12 sps:$4 sm:$0xff] (!%p2302_p4)  }
  0xb3   : > { %616 = vmatpush1.bf16.msra.mxu0 (!%p2302_p4), %v2808_v6  ;;  %v388_v18 = vld [vmem:[%s3486_s17] sm:$0xff] (!%p2302_p4)  ;;  %v389_v19 = vld [vmem:[%s3486_s17 + $0x8] sm:$0xff] (!%p2302_p4)  ;;  %v2828_v24 = vld [vmem:[#allocation8 + $0x90] ss:$12 sps:$4 sm:$0xff] (!%p2302_p4)   ;;  %s4135_s3 = sld [smem:[#allocation23_spill]] (!%p2302_p4)  ;;  %s4136_s7 = sld [smem:[#allocation24_spill]] (!%p2302_p4) }
  0xb4   : > { %2468 = vmatpush3.bf16.msra.mxu1 %v2807_v5  ;;  %617 = vmatprep.subr.bf16.mxu0 %v2809_v7  ;;  %v420_v21 = vpack.c.bf16 %v389_v19, %v388_v18  ;;  %v2825_v22 = vld [vmem:[#allocation8 + $0x94] ss:$12 sps:$4 sm:$0xff]   ;;  %v2829_v25 = vld [vmem:[#allocation8 + $0xac] ss:$12 sps:$4 sm:$0xff]   ;;  %v2831_v26 = vld [vmem:[#allocation8 + $0xb0] ss:$12 sps:$4 sm:$0xff]  }
  0xb5   : > { %2469 = vmatprep.subr.bf16.mxu1 %v2811_v8  ;;  %v2832_v27 = vld [vmem:[#allocation8 + $0xa8] ss:$12 sps:$4 sm:$0xff]   ;;  %v391_v29 = vld [vmem:[%s3486_s17 + $0x18] sm:$0xff]  ;;  %v392_v30 = vld [vmem:[%s3486_s17 + $0x20] sm:$0xff] }
  0xb6   : > { %2481 = vmatprep.mubr.bf16.mxu1 %v420_v21  ;;  %v390_v28 = vld [vmem:[%s3486_s17 + $0x10] sm:$0xff]  ;;  %v393_v31 = vld [vmem:[%s3486_s17 + $0x28] sm:$0xff]  ;;  %v395_v35 = vld [vmem:[%s3486_s17 + $0x38] sm:$0xff] }
  0xb7   : > { %618 = vmatpush1.bf16.msra.mxu0 %v2812_v9  ;;  %v421_v32 = vpack.c.bf16 %v391_v29, %v390_v28  ;;  %v422_v33 = vpack.c.bf16 %v393_v31, %v392_v30  ;;  %v394_v34 = vld [vmem:[%s3486_s17 + $0x30] sm:$0xff]  ;;  %v396_v36 = vld [vmem:[%s3486_s17 + $0x40] sm:$0xff]  ;;  %v397_v37 = vld [vmem:[%s3486_s17 + $0x48] sm:$0xff] }
  0xb8   : > { %2470 = vmatpush3.bf16.msra.mxu1 %v2811_v8  ;;  %619 = vmatprep.subr.bf16.mxu0 %v2813_v10  ;;  %v423_v38 = vpack.c.bf16 %v395_v35, %v394_v34  ;;  %v424_v39 = vpack.c.bf16 %v397_v37, %v396_v36  ;;  %v398_v40 = vld [vmem:[%s3486_s17 + $0x50] sm:$0xff]  ;;  %v399_v41 = vld [vmem:[%s3486_s17 + $0x58] sm:$0xff]  ;;  %v400_v42 = vld [vmem:[%s3486_s17 + $0x60] sm:$0xff]  ;;  %v470_v10 = vlaneseq }
  0xb9   : > { %2471 = vmatprep.subr.bf16.mxu1 %v2815_v11  ;;  %v401_v43 = vld [vmem:[%s3486_s17 + $0x68] sm:$0xff]  ;;  %v425_v44 = vpack.c.bf16 %v399_v41, %v398_v40  ;;  %v402_v46 = vld [vmem:[%s3486_s17 + $0x70] sm:$0xff]  ;;  %v403_v47 = vld [vmem:[%s3486_s17 + $0x78] sm:$0xff] }
  0xba   : > { %v426_v45 = vpack.c.bf16 %v401_v43, %v400_v42  ;;  %v404_v48 = vld [vmem:[%s3486_s17 + $0x80] sm:$0xff]  ;;  %v405_v49 = vld [vmem:[%s3486_s17 + $0x88] sm:$0xff]  ;;  %v427_v50 = vpack.c.bf16 %v403_v47, %v402_v46  ;;  %v406_v52 = vld [vmem:[%s3486_s17 + $0x90] sm:$0xff] }
  0xbb   : > { %620 = vmatpush1.bf16.msra.mxu0 %v2816_v12  ;;  %v428_v51 = vpack.c.bf16 %v405_v49, %v404_v48  ;;  %v407_v53 = vld [vmem:[%s3486_s17 + $0x98] sm:$0xff]  ;;  %v408_v54 = vld [vmem:[%s3486_s17 + $0xa0] sm:$0xff]  ;;  %v409_v55 = vld [vmem:[%s3486_s17 + $0xa8] sm:$0xff] }
  0xbc   : > { %2472 = vmatpush3.bf16.msra.mxu1 %v2815_v11  ;;  %621 = vmatprep.subr.bf16.mxu0 %v2817_v13  ;;  %v429_v56 = vpack.c.bf16 %v407_v53, %v406_v52  ;;  %v430_v57 = vpack.c.bf16 %v409_v55, %v408_v54  ;;  %v410_v58 = vld [vmem:[%s3486_s17 + $0xb0] sm:$0xff]  ;;  %v411_v59 = vld [vmem:[%s3486_s17 + $0xb8] sm:$0xff]  ;;  %v412_v60 = vld [vmem:[%s3486_s17 + $0xc0] sm:$0xff]  ;;  %v471_v11 = vshrl.u32 %v470_v10, 7 }
  0xbd   : > { %2473 = vmatprep.subr.bf16.mxu1 %v2819_v14  ;;  %v413_v61 = vld [vmem:[%s3486_s17 + $0xc8] sm:$0xff]  ;;  %v431_v62 = vpack.c.bf16 %v411_v59, %v410_v58  ;;  %v414_v0 = vld [vmem:[%s3486_s17 + $0xd0] sm:$0xff]  ;;  %v415_v1 = vld [vmem:[%s3486_s17 + $0xd8] sm:$0xff] }
  0xbe   : > { %v432_v63 = vpack.c.bf16 %v413_v61, %v412_v60  ;;  %v416_v3 = vld [vmem:[%s3486_s17 + $0xe0] sm:$0xff]  ;;  %v417_v4 = vld [vmem:[%s3486_s17 + $0xe8] sm:$0xff]  ;;  %v433_v5 = vpack.c.bf16 %v415_v1, %v414_v0  ;;  %v418_v7 = vld [vmem:[%s3486_s17 + $0xf0] sm:$0xff]  ;;  %v480_v12 = vsub.s32 2, %v471_v11  ;;  %v472_v13 = vsub.s32 0, %v471_v11 }
  0xbf   : > { %622 = vmatpush1.bf16.msra.mxu0 %v2820_v15  ;;  %v434_v6 = vpack.c.bf16 %v417_v4, %v416_v3  ;;  %v419_v8 = vld [vmem:[%s3486_s17 + $0xf8] sm:$0xff]  ;;  %v476_v15 = vsub.s32 1, %v471_v11 }
  0xc0   : > { %2474 = vmatpush3.bf16.msra.mxu1 %v2819_v14  ;;  %623 = vmatprep.subr.bf16.mxu0 %v2821_v16  ;;  %v435_v9 = vpack.c.bf16 %v419_v8, %v418_v7  ;;  %v468_v14 = vld [vmem:[%s4089_s2] sm:$0x7] }
  0xc1   : > { %2475 = vmatprep.subr.bf16.mxu1 %v2823_v17  ;;  %v3559_v16 = vrot.slane %v468_v14, %v480_v12 }
  0xc3   : > { %624 = vmatpush1.bf16.msra.mxu0 %v2824_v20  ;;  %v3563_v20 = vrot.slane %v468_v14, %v476_v15 }
  0xc4   : > { %2476 = vmatpush3.bf16.msra.mxu1 %v2823_v17  ;;  %625 = vmatprep.subr.bf16.mxu0 %v2825_v22  ;;  %v3561_v17 = vrot.slane %v468_v14, %v472_v13 }
  0xc5   : > { %2477 = vmatprep.subr.bf16.mxu1 %v2827_v23 }
  0xc7   : > { %626 = vmatpush1.bf16.msra.mxu0 %v2828_v24 }
  0xc8   : > { %2478 = vmatpush3.bf16.msra.mxu1 %v2827_v23  ;;  %627 = vmatprep.subr.bf16.mxu0 %v2829_v25 }
  0xc9   : > { %2479 = vmatprep.subr.bf16.mxu1 %v2831_v26 }
  0xcb   : > { %628 = vmatpush1.bf16.msra.mxu0 %v2832_v27 }
  0xcc   : > { %2480 = vmatpush3.bf16.msra.mxu1 %v2831_v26 }
  0xce   : > { %646 = vmatmul.mubr.bf16.vlgmr.msra.gmra.mrb[0].mxu0 %v420_v21 }
  0xcf   : > { %2482 = vmatmul.mubr.bf16.vlgmr.msra.gmra.mrb[0].mxu1 %v421_v32  ;;  %655 = vmatprep.mubr.bf16.mxu0 %v3201_v2 }
  0xd0   : > { %2485 = vmatprep.mubr.bf16.mxu1 %v422_v33 }
  0xd6   : > { %656 = vmatmul.mubr.bf16.gmra.mrb[4].mxu0 %v421_v32 }
  0xd7   : > { %2486 = vmatmul.mubr.bf16.gmra.mrb[4].mxu1 %v423_v38  ;;  %665 = vmatprep.mubr.bf16.mxu0 %v3201_v2 }
  0xd8   : > { %2489 = vmatprep.mubr.bf16.mxu1 %v424_v39 }
  0xde   : > { %666 = vmatmul.mubr.bf16.gmra.mrb[8].mxu0 %v422_v33 }
  0xdf   : > { %2490 = vmatmul.mubr.bf16.gmra.mrb[8].mxu1 %v425_v44  ;;  %675 = vmatprep.mubr.bf16.mxu0 %v3201_v2 }
  0xe0   : > { %2493 = vmatprep.mubr.bf16.mxu1 %v426_v45 }
  0xe6   : > { %676 = vmatmul.mubr.bf16.gmra.mrb[12].mxu0 %v423_v38 }
  0xe7   : > { %2494 = vmatmul.mubr.bf16.gmra.mrb[12].mxu1 %v427_v50  ;;  %685 = vmatprep.mubr.bf16.mxu0 %v3201_v2 }
  0xe8   : > { %2497 = vmatprep.mubr.bf16.mxu1 %v428_v51 }
  0xee   : > { %686 = vmatmul.mubr.bf16.gmra.mrb[16].mxu0 %v424_v39 }
  0xef   : > { %2498 = vmatmul.mubr.bf16.gmra.mrb[16].mxu1 %v429_v56  ;;  %695 = vmatprep.mubr.bf16.mxu0 %v3201_v2 }
  0xf0   : > { %2501 = vmatprep.mubr.bf16.mxu1 %v430_v57 }
  0xf6   : > { %696 = vmatmul.mubr.bf16.gmra.mrb[20].mxu0 %v425_v44 }
  0xf7   : > { %2502 = vmatmul.mubr.bf16.gmra.mrb[20].mxu1 %v431_v62  ;;  %705 = vmatprep.mubr.bf16.mxu0 %v3201_v2 }
  0xf8   : > { %2505 = vmatprep.mubr.bf16.mxu1 %v432_v63 }
  0xfe   : > { %706 = vmatmul.mubr.bf16.gmra.mrb[24].mxu0 %v426_v45 }
  0xff   : > { %2506 = vmatmul.mubr.bf16.gmra.mrb[24].mxu1 %v433_v5  ;;  %715 = vmatprep.mubr.bf16.mxu0 %v3201_v2 }
 0x100   : > { %2509 = vmatprep.mubr.bf16.mxu1 %v434_v6 }
 0x106   : > { %716 = vmatmul.mubr.bf16.gmra.mrb[28].mxu0 %v427_v50 }
 0x107   : > { %2510 = vmatmul.mubr.bf16.gmra.mrb[28].mxu1 %v435_v9  ;;  %725 = vmatprep.mubr.bf16.mxu0 %v3201_v2 }
 0x10e   : > { %726 = vmatmul.mubr.bf16.gmra.mrb[32].mxu0 %v428_v51 }
 0x10f   : > { %735 = vmatprep.mubr.bf16.mxu0 %v3201_v2 }
 0x116   : > { %736 = vmatmul.mubr.bf16.gmra.mrb[36].mxu0 %v429_v56 }
 0x117   : > { %745 = vmatprep.mubr.bf16.mxu0 %v3201_v2 }
 0x11e   : > { %746 = vmatmul.mubr.bf16.gmra.mrb[40].mxu0 %v430_v57 }
 0x11f   : > { %755 = vmatprep.mubr.bf16.mxu0 %v3201_v2 }
 0x126   : > { %756 = vmatmul.mubr.bf16.gmra.mrb[44].mxu0 %v431_v62 }
 0x127   : > { %765 = vmatprep.mubr.bf16.mxu0 %v3201_v2 }
 0x12e   : > { %766 = vmatmul.mubr.bf16.gmra.mrb[48].mxu0 %v432_v63 }
 0x12f   : > { %775 = vmatprep.mubr.bf16.mxu0 %v3201_v2 }
 0x136   : > { %776 = vmatmul.mubr.bf16.gmra.mrb[52].mxu0 %v433_v5 }
 0x137   : > { %785 = vmatprep.mubr.bf16.mxu0 %v3201_v2 }
 0x13e   : > { %786 = vmatmul.mubr.bf16.gmra.mrb[56].mxu0 %v434_v6 }
 0x13f   : > { %795 = vmatprep.mubr.bf16.mxu0 %v3201_v2  ;;  %v2835_v2 = vld [vmem:[%s4135_s3 + $0x4] ss:$8 sps:$4 sm:$0xff]  }
 0x140   : > { %1255 = vmatprep.mubr.bf16.mxu1 %v2835_v2 }
 0x146   : > { %796 = vmatmul.mubr.bf16.gmra.mrb[60].mxu0 %v435_v9 }
 0x1a1   : > { %v647_v18 = vpop.f32.mrb[0].mxu0 }
 0x1a2   : > { %v2483_v19 = vpop.f32.mrb[0].mxu1  ;;  %v649_v22 = vpop.f32.mrb[1].mxu0  ;;  %v648_v27 = vadd.f32 %v647_v18, %v3561_v17 }
 0x1a3   : > { %v849_v21 = vadd.f32 %v2483_v19, %v3559_v16  ;;  %v840_v23 = vpop.f32.mrb[1].mxu1  ;;  %v651_v25 = vpop.f32.mrb[2].mxu0  ;;  %v650_v32 = vadd.f32 %v649_v22, %v3563_v20 }
 0x1a4   : > { %v841_v24 = vadd.f32 %v840_v23, %v3559_v16  ;;  %v2484_v26 = vpop.f32.mrb[2].mxu1  ;;  %v652_v28 = vadd.f32 %v651_v25, %v3561_v17  ;;  %v653_v30 = vpop.f32.mrb[3].mxu0 }
 0x1a5   : > { %v852_v29 = vadd.f32 %v2484_v26, %v3559_v16  ;;  %v843_v31 = vpop.f32.mrb[3].mxu1  ;;  %v654_v33 = vadd.f32 %v653_v30, %v3563_v20 }
 0x1a6   : > { %v844_v34 = vadd.f32 %v843_v31, %v3559_v16  ;;  %v967_v35 = vpack.c.bf16 %v652_v28, %v648_v27 }
 0x1a7   : > { %v1002_v36 = vpack.c.bf16 %v852_v29, %v849_v21  ;;  %v999_v37 = vpack.c.bf16 %v654_v33, %v650_v32 }
 0x1a8   : > { %v1000_v38 = vpack.c.bf16 %v844_v34, %v841_v24  ;;  %983 = vst [vmem:[#allocation2] sm:$0xff] %v967_v35 }
 0x1a9   : > { %v657_v39 = vpop.f32.mrb[4].mxu0 }
 0x1aa   : > { %1223 = vmatprep.subr.bf16.mxu1 %v1000_v38  ;;  %v2487_v40 = vpop.f32.mrb[4].mxu1  ;;  %v659_v41 = vpop.f32.mrb[5].mxu0  ;;  %v658_v47 = vadd.f32 %v657_v39, %v3561_v17 }
 0x1ab   : > { %1224 = vmatpush1.bf16.msra.mxu1 %v999_v37  ;;  %v865_v42 = vadd.f32 %v2487_v40, %v3559_v16  ;;  %v856_v43 = vpop.f32.mrb[5].mxu1  ;;  %v661_v44 = vpop.f32.mrb[6].mxu0  ;;  %v660_v52 = vadd.f32 %v659_v41, %v3563_v20 }
 0x1ac   : > { %1225 = vmatprep.subr.bf16.mxu1 %v1002_v36  ;;  %v857_v45 = vadd.f32 %v856_v43, %v3559_v16  ;;  %v2488_v46 = vpop.f32.mrb[6].mxu1  ;;  %v662_v48 = vadd.f32 %v661_v44, %v3561_v17  ;;  %v663_v49 = vpop.f32.mrb[7].mxu0 }
 0x1ad   : > { %v868_v50 = vadd.f32 %v2488_v46, %v3559_v16  ;;  %v859_v51 = vpop.f32.mrb[7].mxu1  ;;  %v664_v53 = vadd.f32 %v663_v49, %v3563_v20 }
 0x1ae   : > { %v860_v54 = vadd.f32 %v859_v51, %v3559_v16  ;;  %v968_v55 = vpack.c.bf16 %v662_v48, %v658_v47 }
 0x1af   : > { %v1006_v56 = vpack.c.bf16 %v868_v50, %v865_v42  ;;  %v1001_v57 = vpack.c.bf16 %v664_v53, %v660_v52 }
 0x1b0   : > { %v1004_v58 = vpack.c.bf16 %v860_v54, %v857_v45  ;;  %984 = vst [vmem:[#allocation2 + $0x8] sm:$0xff] %v968_v55 }
 0x1b1   : > { %v667_v59 = vpop.f32.mrb[8].mxu0  ;;  %1226 = vmatpush1.bf16.msra.mxu1 %v1001_v57 }
 0x1b2   : > { %v2491_v60 = vpop.f32.mrb[8].mxu1  ;;  %v669_v61 = vpop.f32.mrb[9].mxu0  ;;  %1227 = vmatprep.subr.bf16.mxu1 %v1004_v58  ;;  %v668_v4 = vadd.f32 %v667_v59, %v3561_v17 }
 0x1b3   : > { %v3585_v62 = vadd.f32 %v2491_v60, %v3559_v16  ;;  %v872_v63 = vpop.f32.mrb[9].mxu1  ;;  %v671_v0 = vpop.f32.mrb[10].mxu0  ;;  %v670_v9 = vadd.f32 %v669_v61, %v3563_v20 }
 0x1b4   : > { %v873_v1 = vadd.f32 %v872_v63, %v3559_v16  ;;  %v2492_v3 = vpop.f32.mrb[10].mxu1  ;;  %v672_v5 = vadd.f32 %v671_v0, %v3561_v17  ;;  %v673_v6 = vpop.f32.mrb[11].mxu0 }
 0x1b5   : > { %v884_v7 = vadd.f32 %v2492_v3, %v3559_v16  ;;  %v875_v8 = vpop.f32.mrb[11].mxu1  ;;  %v674_v10 = vadd.f32 %v673_v6, %v3563_v20 }
 0x1b6   : > { %v876_v11 = vadd.f32 %v875_v8, %v3559_v16  ;;  %v969_v12 = vpack.c.bf16 %v672_v5, %v668_v4 }
 0x1b7   : > { %v1010_v13 = vpack.c.bf16 %v884_v7, %v3585_v62  ;;  %v1003_v14 = vpack.c.bf16 %v674_v10, %v670_v9 }
 0x1b8   : > { %v1008_v15 = vpack.c.bf16 %v876_v11, %v873_v1  ;;  %985 = vst [vmem:[#allocation2 + $0x10] sm:$0xff] %v969_v12 }
 0x1b9   : > { %v677_v18 = vpop.f32.mrb[12].mxu0  ;;  %1228 = vmatpush1.bf16.msra.mxu1 %v1003_v14 }
 0x1ba   : > { %v2495_v19 = vpop.f32.mrb[12].mxu1  ;;  %v679_v2 = vpop.f32.mrb[13].mxu0  ;;  %1229 = vmatprep.subr.bf16.mxu1 %v1006_v56  ;;  %v678_v26 = vadd.f32 %v677_v18, %v3561_v17 }
 0x1bb   : > { %v3596_v21 = vadd.f32 %v2495_v19, %v3559_v16  ;;  %v888_v22 = vpop.f32.mrb[13].mxu1  ;;  %v681_v23 = vpop.f32.mrb[14].mxu0  ;;  %v680_v31 = vadd.f32 %v679_v2, %v3563_v20 }
 0x1bc   : > { %v3599_v24 = vadd.f32 %v888_v22, %v3559_v16  ;;  %v2496_v25 = vpop.f32.mrb[14].mxu1  ;;  %v682_v27 = vadd.f32 %v681_v23, %v3561_v17  ;;  %v683_v28 = vpop.f32.mrb[15].mxu0 }
 0x1bd   : > { %v3604_v29 = vadd.f32 %v2496_v25, %v3559_v16  ;;  %v891_v30 = vpop.f32.mrb[15].mxu1  ;;  %v684_v32 = vadd.f32 %v683_v28, %v3563_v20 }
 0x1be   : > { %v892_v33 = vadd.f32 %v891_v30, %v3559_v16  ;;  %v970_v34 = vpack.c.bf16 %v682_v27, %v678_v26 }
 0x1bf   : > { %v1014_v35 = vpack.c.bf16 %v3604_v29, %v3596_v21  ;;  %v1005_v36 = vpack.c.bf16 %v684_v32, %v680_v31  ;;  %v1047_v21 = vld [vmem:[%s4136_s7] sm:$0xff]  ;;  %v1049_v29 = vld [vmem:[%s4136_s7 + $0x10] sm:$0xff] }
 0x1c0   : > { %v1012_v37 = vpack.c.bf16 %v892_v33, %v3599_v24  ;;  %986 = vst [vmem:[#allocation2 + $0x18] sm:$0xff] %v970_v34  ;;  %1065 = vperm.xlu0 %2799, %v1047_v21   ;;  %1075 = vperm.xlu1 %2800, %v1049_v29  }
 0x1c1   : > { %v687_v38 = vpop.f32.mrb[16].mxu0  ;;  %1230 = vmatpush1.bf16.msra.mxu1 %v1005_v36 }
 0x1c2   : > { %v2499_v39 = vpop.f32.mrb[16].mxu1  ;;  %v689_v40 = vpop.f32.mrb[17].mxu0  ;;  %1231 = vmatprep.subr.bf16.mxu1 %v1008_v15  ;;  %v688_v46 = vadd.f32 %v687_v38, %v3561_v17 }
 0x1c3   : > { %v3613_v41 = vadd.f32 %v2499_v39, %v3559_v16  ;;  %v904_v42 = vpop.f32.mrb[17].mxu1  ;;  %v691_v43 = vpop.f32.mrb[18].mxu0  ;;  %v690_v51 = vadd.f32 %v689_v40, %v3563_v20 }
 0x1c4   : > { %v3616_v44 = vadd.f32 %v904_v42, %v3559_v16  ;;  %v2500_v45 = vpop.f32.mrb[18].mxu1  ;;  %v692_v47 = vadd.f32 %v691_v43, %v3561_v17  ;;  %v693_v48 = vpop.f32.mrb[19].mxu0 }
 0x1c5   : > { %v3621_v49 = vadd.f32 %v2500_v45, %v3559_v16  ;;  %v907_v50 = vpop.f32.mrb[19].mxu1  ;;  %v694_v52 = vadd.f32 %v693_v48, %v3563_v20 }
 0x1c6   : > { %v3626_v53 = vadd.f32 %v907_v50, %v3559_v16  ;;  %v971_v54 = vpack.c.bf16 %v692_v47, %v688_v46 }
 0x1c7   : > { %v1018_v55 = vpack.c.bf16 %v3621_v49, %v3613_v41  ;;  %v1007_v56 = vpack.c.bf16 %v694_v52, %v690_v51 }
 0x1c8   : > { %v1016_v57 = vpack.c.bf16 %v3626_v53, %v3616_v44  ;;  %987 = vst [vmem:[#allocation2 + $0x20] sm:$0xff] %v971_v54 }
 0x1c9   : > { %v697_v58 = vpop.f32.mrb[20].mxu0  ;;  %1232 = vmatpush1.bf16.msra.mxu1 %v1007_v56 }
 0x1ca   : > { %v2503_v59 = vpop.f32.mrb[20].mxu1  ;;  %v699_v60 = vpop.f32.mrb[21].mxu0  ;;  %1233 = vmatprep.subr.bf16.mxu1 %v1010_v13  ;;  %v698_v3 = vadd.f32 %v697_v58, %v3561_v17 }
 0x1cb   : > { %v3633_v61 = vadd.f32 %v2503_v59, %v3559_v16  ;;  %v920_v62 = vpop.f32.mrb[21].mxu1  ;;  %v701_v63 = vpop.f32.mrb[22].mxu0  ;;  %v700_v8 = vadd.f32 %v699_v60, %v3563_v20 }
 0x1cc   : > { %v3636_v0 = vadd.f32 %v920_v62, %v3559_v16  ;;  %v2504_v1 = vpop.f32.mrb[22].mxu1  ;;  %v702_v4 = vadd.f32 %v701_v63, %v3561_v17  ;;  %v703_v5 = vpop.f32.mrb[23].mxu0 }
 0x1cd   : > { %v3641_v6 = vadd.f32 %v2504_v1, %v3559_v16  ;;  %v923_v7 = vpop.f32.mrb[23].mxu1  ;;  %v704_v9 = vadd.f32 %v703_v5, %v3563_v20  ;;  %v1048_v1 = vld [vmem:[%s4136_s7 + $0x8] sm:$0xff]  ;;  %v1050_v5 = vld [vmem:[%s4136_s7 + $0x18] sm:$0xff] }
 0x1ce   : > { %v3646_v10 = vadd.f32 %v923_v7, %v3559_v16  ;;  %v972_v11 = vpack.c.bf16 %v702_v4, %v698_v3  ;;  %1070 = vperm.xlu0 %2799, %v1048_v1   ;;  %1080 = vperm.xlu1 %2800, %v1050_v5  }
 0x1cf   : > { %v1022_v12 = vpack.c.bf16 %v3641_v6, %v3633_v61  ;;  %v1009_v13 = vpack.c.bf16 %v704_v9, %v700_v8  ;;  %v1051_v8 = vld [vmem:[%s4136_s7 + $0x20] sm:$0xff] }
 0x1d0   : > { %v1020_v14 = vpack.c.bf16 %v3646_v10, %v3636_v0  ;;  %988 = vst [vmem:[#allocation2 + $0x28] sm:$0xff] %v972_v11  ;;  %v1052_v11 = vld [vmem:[%s4136_s7 + $0x28] sm:$0xff] }
 0x1d1   : > { %v707_v15 = vpop.f32.mrb[24].mxu0  ;;  %1234 = vmatpush1.bf16.msra.mxu1 %v1009_v13 }
 0x1d2   : > { %v2507_v18 = vpop.f32.mrb[24].mxu1  ;;  %v709_v19 = vpop.f32.mrb[25].mxu0  ;;  %1235 = vmatprep.subr.bf16.mxu1 %v1012_v37  ;;  %v708_v26 = vadd.f32 %v707_v15, %v3561_v17  ;;  %1085 = vperm.xlu0 %2799, %v1051_v8  }
 0x1d3   : > { %v3653_v2 = vadd.f32 %v2507_v18, %v3559_v16  ;;  %v936_v22 = vpop.f32.mrb[25].mxu1  ;;  %v711_v23 = vpop.f32.mrb[26].mxu0  ;;  %v710_v32 = vadd.f32 %v709_v19, %v3563_v20  ;;  %1090 = vperm.xlu1 %2800, %v1052_v11  }
 0x1d4   : > { %v3656_v24 = vadd.f32 %v936_v22, %v3559_v16  ;;  %v2508_v25 = vpop.f32.mrb[26].mxu1  ;;  %v712_v27 = vadd.f32 %v711_v23, %v3561_v17  ;;  %v713_v28 = vpop.f32.mrb[27].mxu0  ;;  %v1054_v23 = vld [vmem:[%s4136_s7 + $0x38] sm:$0xff] }
 0x1d5   : > { %v3661_v30 = vadd.f32 %v2508_v25, %v3559_v16  ;;  %v939_v31 = vpop.f32.mrb[27].mxu1  ;;  %v714_v33 = vadd.f32 %v713_v28, %v3563_v20 }
 0x1d6   : > { %v3666_v34 = vadd.f32 %v939_v31, %v3559_v16  ;;  %v973_v36 = vpack.c.bf16 %v712_v27, %v708_v26  ;;  %v1055_v27 = vld [vmem:[%s4136_s7 + $0x40] sm:$0xff]  ;;  %v1056_v31 = vld [vmem:[%s4136_s7 + $0x48] sm:$0xff] }
 0x1d7   : > { %v1026_v37 = vpack.c.bf16 %v3661_v30, %v3653_v2  ;;  %v1011_v38 = vpack.c.bf16 %v714_v33, %v710_v32  ;;  %1100 = vperm.xlu1 %2800, %v1054_v23  }
 0x1d8   : > { %v1024_v39 = vpack.c.bf16 %v3666_v34, %v3656_v24  ;;  %989 = vst [vmem:[#allocation2 + $0x30] sm:$0xff] %v973_v36 }
 0x1d9   : > { %v717_v40 = vpop.f32.mrb[28].mxu0  ;;  %1236 = vmatpush1.bf16.msra.mxu1 %v1011_v38 }
 0x1da   : > { %v2511_v42 = vpop.f32.mrb[28].mxu1  ;;  %v719_v43 = vpop.f32.mrb[29].mxu0  ;;  %1237 = vmatprep.subr.bf16.mxu1 %v1014_v35  ;;  %v718_v51 = vadd.f32 %v717_v40, %v3561_v17 }
 0x1db   : > { %v3676_v45 = vadd.f32 %v2511_v42, %v3559_v16  ;;  %v952_v46 = vpop.f32.mrb[29].mxu1  ;;  %v721_v47 = vpop.f32.mrb[30].mxu0  ;;  %v720_v35 = vadd.f32 %v719_v43, %v3563_v20  ;;  %1110 = vperm.xlu1 %2800, %v1056_v31   ;;  %v1058_v42 = vld [vmem:[%s4136_s7 + $0x58] sm:$0xff] }
 0x1dc   : > { %v3679_v48 = vadd.f32 %v952_v46, %v3559_v16  ;;  %v2512_v50 = vpop.f32.mrb[30].mxu1  ;;  %v722_v52 = vadd.f32 %v721_v47, %v3561_v17  ;;  %v723_v54 = vpop.f32.mrb[31].mxu0  ;;  %v1059_v47 = vld [vmem:[%s4136_s7 + $0x60] sm:$0xff] }
 0x1dd   : > { %v3684_v56 = vadd.f32 %v2512_v50, %v3559_v16  ;;  %v955_v58 = vpop.f32.mrb[31].mxu1  ;;  %v724_v59 = vadd.f32 %v723_v54, %v3563_v20 }
 0x1de   : > { %v3695_v60 = vadd.f32 %v955_v58, %v3559_v16  ;;  %v974_v62 = vpack.c.bf16 %v722_v52, %v718_v51  ;;  %v1060_v51 = vld [vmem:[%s4136_s7 + $0x68] sm:$0xff] }
 0x1df   : > { %v1030_v63 = vpack.c.bf16 %v3684_v56, %v3676_v45  ;;  %v1013_v3 = vpack.c.bf16 %v724_v59, %v720_v35  ;;  %1120 = vperm.xlu1 %2800, %v1058_v42   ;;  %v1062_v35 = vld [vmem:[%s4136_s7 + $0x78] sm:$0xff]  ;;  %v2841_v56 = vld [vmem:[%s4135_s3 + $0x20] ss:$8 sps:$4 sm:$0xff]  }
 0x1e0   : > { %v1028_v4 = vpack.c.bf16 %v3695_v60, %v3679_v48  ;;  %990 = vst [vmem:[#allocation2 + $0x38] sm:$0xff] %v974_v62  ;;  %v2836_v45 = vld [vmem:[%s4135_s3 + $0x14] ss:$8 sps:$4 sm:$0xff]  }
 0x1e1   : > { %v727_v16 = vpop.f32.mrb[32].mxu0  ;;  %1238 = vmatpush1.bf16.msra.mxu1 %v1013_v3 }
 0x1e2   : > { %v729_v7 = vpop.f32.mrb[33].mxu0  ;;  %1239 = vmatprep.subr.bf16.mxu1 %v1016_v57  ;;  %v728_v13 = vadd.f32 %v727_v16, %v3561_v17  ;;  %v1053_v57 = vld [vmem:[%s4136_s7 + $0x30] sm:$0xff] }
 0x1e3   : > { %v731_v9 = vpop.f32.mrb[34].mxu0  ;;  %v730_v19 = vadd.f32 %v729_v7, %v3563_v20  ;;  %1095 = vperm.xlu0 %2799, %v1053_v57   ;;  %1130 = vperm.xlu1 %2800, %v1060_v51  }
 0x1e4   : > { %v732_v15 = vadd.f32 %v731_v9, %v3561_v17  ;;  %v733_v18 = vpop.f32.mrb[35].mxu0 }
 0x1e5   : > { %v734_v44 = vadd.f32 %v733_v18, %v3563_v20 }
 0x1e6   : > { %v975_v53 = vpack.c.bf16 %v732_v15, %v728_v13 }
 0x1e7   : > { %v1015_v22 = vpack.c.bf16 %v734_v44, %v730_v19  ;;  %1105 = vperm.xlu0 %2799, %v1055_v27   ;;  %1140 = vperm.xlu1 %2800, %v1062_v35   ;;  %v2854_v35 = vld [vmem:[%s4135_s3 + $0x74] ss:$8 sps:$4 sm:$0xff]  }
 0x1e8   : > { %991 = vst [vmem:[#allocation2 + $0x40] sm:$0xff] %v975_v53 }
 0x1e9   : > { %v737_v25 = vpop.f32.mrb[36].mxu0  ;;  %1240 = vmatpush1.bf16.msra.mxu1 %v1015_v22 }
 0x1ea   : > { %v739_v26 = vpop.f32.mrb[37].mxu0  ;;  %1241 = vmatprep.subr.bf16.mxu1 %v1018_v55  ;;  %v738_v32 = vadd.f32 %v737_v25, %v3561_v17  ;;  %v1057_v55 = vld [vmem:[%s4136_s7 + $0x50] sm:$0xff] }
 0x1eb   : > { %v741_v28 = vpop.f32.mrb[38].mxu0  ;;  %v740_v38 = vadd.f32 %v739_v26, %v3563_v20  ;;  %1115 = vperm.xlu0 %2799, %v1057_v55  }
 0x1ec   : > { %v742_v33 = vadd.f32 %v741_v28, %v3561_v17  ;;  %v743_v36 = vpop.f32.mrb[39].mxu0 }
 0x1ed   : > { %v744_v41 = vadd.f32 %v743_v36, %v3563_v20 }
 0x1ee   : > { %v976_v49 = vpack.c.bf16 %v742_v33, %v738_v32 }
 0x1ef   : > { %v1017_v40 = vpack.c.bf16 %v744_v41, %v740_v38  ;;  %1125 = vperm.xlu0 %2799, %v1059_v47  }
 0x1f0   : > { %992 = vst [vmem:[#allocation2 + $0x48] sm:$0xff] %v976_v49 }
 0x1f1   : > { %v747_v43 = vpop.f32.mrb[40].mxu0  ;;  %1242 = vmatpush1.bf16.msra.mxu1 %v1017_v40 }
 0x1f2   : > { %v749_v46 = vpop.f32.mrb[41].mxu0  ;;  %1243 = vmatprep.subr.bf16.mxu1 %v1020_v14  ;;  %v748_v52 = vadd.f32 %v747_v43, %v3561_v17  ;;  %v1061_v14 = vld [vmem:[%s4136_s7 + $0x70] sm:$0xff] }
 0x1f3   : > { %v751_v50 = vpop.f32.mrb[42].mxu0  ;;  %v750_v21 = vadd.f32 %v749_v46, %v3563_v20  ;;  %1135 = vperm.xlu0 %2799, %v1061_v14   ;;  %v2851_v14 = vld [vmem:[%s4135_s3 + $0x64] ss:$8 sps:$4 sm:$0xff]  }
 0x1f4   : > { %v752_v54 = vadd.f32 %v751_v50, %v3561_v17  ;;  %v753_v58 = vpop.f32.mrb[43].mxu0 }
 0x1f5   : > { %v754_v0 = vadd.f32 %v753_v58, %v3563_v20  ;;  %v2845_v58 = vld [vmem:[%s4135_s3 + $0x44] ss:$8 sps:$4 sm:$0xff]  }
 0x1f6   : > { %v977_v10 = vpack.c.bf16 %v752_v54, %v748_v52  ;;  %v2833_v52 = vld [vmem:[%s4135_s3] ss:$8 sps:$4 sm:$0xff]   ;;  %v2844_v54 = vld [vmem:[%s4135_s3 + $0x30] ss:$8 sps:$4 sm:$0xff]  }
 0x1f7   : > { %v1019_v29 = vpack.c.bf16 %v754_v0, %v750_v21  ;;  %v2847_v21 = vld [vmem:[%s4135_s3 + $0x40] ss:$8 sps:$4 sm:$0xff]   ;;  %v2848_v0 = vld [vmem:[%s4135_s3 + $0x54] ss:$8 sps:$4 sm:$0xff]  }
 0x1f8   : > { %993 = vst [vmem:[#allocation2 + $0x50] sm:$0xff] %v977_v10  ;;  %v2850_v10 = vld [vmem:[%s4135_s3 + $0x50] ss:$8 sps:$4 sm:$0xff]  }
 0x1f9   : > { %v757_v59 = vpop.f32.mrb[44].mxu0  ;;  %1244 = vmatpush1.bf16.msra.mxu1 %v1019_v29  ;;  %v2853_v29 = vld [vmem:[%s4135_s3 + $0x60] ss:$8 sps:$4 sm:$0xff]  }
 0x1fa   : > { %v759_v62 = vpop.f32.mrb[45].mxu0  ;;  %1245 = vmatprep.subr.bf16.mxu1 %v1022_v12  ;;  %v758_v3 = vadd.f32 %v757_v59, %v3561_v17  ;;  %v2856_v59 = vld [vmem:[%s4135_s3 + $0x70] ss:$8 sps:$4 sm:$0xff]  }
 0x1fb   : > { %v761_v1 = vpop.f32.mrb[46].mxu0  ;;  %v760_v7 = vadd.f32 %v759_v62, %v3563_v20 }
 0x1fc   : > { %v762_v5 = vadd.f32 %v761_v1, %v3561_v17  ;;  %v763_v16 = vpop.f32.mrb[47].mxu0 }
 0x1fd   : > { %v764_v8 = vadd.f32 %v763_v16, %v3563_v20 }
 0x1fe   : > { %v978_v9 = vpack.c.bf16 %v762_v5, %v758_v3 }
 0x1ff   : > { %v1021_v11 = vpack.c.bf16 %v764_v8, %v760_v7 }
 0x200   : > { %994 = vst [vmem:[#allocation2 + $0x58] sm:$0xff] %v978_v9  ;;  %v2857_v9 = vld [vmem:[#allocation10] sm:$0xff]  }
 0x201   : > { %v767_v13 = vpop.f32.mrb[48].mxu0  ;;  %1246 = vmatpush1.bf16.msra.mxu1 %v1021_v11 }
 0x202   : > { %v769_v15 = vpop.f32.mrb[49].mxu0  ;;  %1247 = vmatprep.subr.bf16.mxu1 %v1024_v39  ;;  %v768_v6 = vadd.f32 %v767_v13, %v3561_v17 }
 0x203   : > { %v771_v61 = vpop.f32.mrb[50].mxu0  ;;  %v770_v19 = vadd.f32 %v769_v15, %v3563_v20 }
 0x204   : > { %v772_v12 = vadd.f32 %v771_v61, %v3561_v17  ;;  %v773_v18 = vpop.f32.mrb[51].mxu0 }
 0x205   : > { %v774_v44 = vadd.f32 %v773_v18, %v3563_v20 }
 0x206   : > { %v979_v53 = vpack.c.bf16 %v772_v12, %v768_v6 }
 0x207   : > { %v1023_v57 = vpack.c.bf16 %v774_v44, %v770_v19 }
 0x208   : > { %995 = vst [vmem:[#allocation2 + $0x60] sm:$0xff] %v979_v53 }
 0x209   : > { %v777_v22 = vpop.f32.mrb[52].mxu0  ;;  %1248 = vmatpush1.bf16.msra.mxu1 %v1023_v57 }
 0x20a   : > { %v779_v23 = vpop.f32.mrb[53].mxu0  ;;  %1249 = vmatprep.subr.bf16.mxu1 %v1026_v37  ;;  %v778_v34 = vadd.f32 %v777_v22, %v3561_v17 }
 0x20b   : > { %v781_v24 = vpop.f32.mrb[54].mxu0  ;;  %v780_v26 = vadd.f32 %v779_v23, %v3563_v20 }
 0x20c   : > { %v782_v39 = vadd.f32 %v781_v24, %v3561_v17  ;;  %v783_v25 = vpop.f32.mrb[55].mxu0 }
 0x20d   : > { %v784_v27 = vadd.f32 %v783_v25, %v3563_v20 }
 0x20e   : > { %v980_v28 = vpack.c.bf16 %v782_v39, %v778_v34  ;;  %v2858_v34 = vld [vmem:[#allocation10 + $0x8] sm:$0xff]  }
 0x20f   : > { %v1025_v31 = vpack.c.bf16 %v784_v27, %v780_v26 }
 0x210   : > { %996 = vst [vmem:[#allocation2 + $0x68] sm:$0xff] %v980_v28 }
 0x211   : > { %v787_v32 = vpop.f32.mrb[56].mxu0  ;;  %1250 = vmatpush1.bf16.msra.mxu1 %v1025_v31 }
 0x212   : > { %v789_v33 = vpop.f32.mrb[57].mxu0  ;;  %1251 = vmatprep.subr.bf16.mxu1 %v1028_v4  ;;  %v788_v30 = vadd.f32 %v787_v32, %v3561_v17 }
 0x213   : > { %v791_v2 = vpop.f32.mrb[58].mxu0  ;;  %v790_v38 = vadd.f32 %v789_v33, %v3563_v20 }
 0x214   : > { %v792_v37 = vadd.f32 %v791_v2, %v3561_v17  ;;  %v793_v36 = vpop.f32.mrb[59].mxu0 }
 0x215   : > { %v794_v41 = vadd.f32 %v793_v36, %v3563_v20 }
 0x216   : > { %v981_v49 = vpack.c.bf16 %v792_v37, %v788_v30 }
 0x217   : > { %v1027_v55 = vpack.c.bf16 %v794_v41, %v790_v38 }
 0x218   : > { %997 = vst [vmem:[#allocation2 + $0x70] sm:$0xff] %v981_v49  ;;  %v2859_v49 = vld [vmem:[#allocation10 + $0x10] sm:$0xff]  }
 0x219   : > { %v797_v40 = vpop.f32.mrb[60].mxu0  ;;  %1252 = vmatpush1.bf16.msra.mxu1 %v1027_v55 }
 0x21a   : > { %v799_v42 = vpop.f32.mrb[61].mxu0  ;;  %1253 = vmatprep.subr.bf16.mxu1 %v1030_v63  ;;  %v798_v60 = vadd.f32 %v797_v40, %v3561_v17  ;;  %v2842_v63 = vld [vmem:[%s4135_s3 + $0x34] ss:$8 sps:$4 sm:$0xff]  }
 0x21b   : > { %v801_v48 = vpop.f32.mrb[62].mxu0  ;;  %v800_v46 = vadd.f32 %v799_v42, %v3563_v20 }
 0x21c   : > { %v802_v4 = vadd.f32 %v801_v48, %v3561_v17  ;;  %v803_v43 = vpop.f32.mrb[63].mxu0  ;;  %v2838_v17 = vld [vmem:[%s4135_s3 + $0x10] ss:$8 sps:$4 sm:$0xff]  }
 0x21d   : > { %v804_v47 = vadd.f32 %v803_v43, %v3563_v20  ;;  %v2839_v20 = vld [vmem:[%s4135_s3 + $0x24] ss:$8 sps:$4 sm:$0xff]  }
 0x21e   : > { %v982_v50 = vpack.c.bf16 %v802_v4, %v798_v60 }
 0x21f   : > { %v1029_v51 = vpack.c.bf16 %v804_v47, %v800_v46 }
 0x220   : > { %998 = vst [vmem:[#allocation2 + $0x78] sm:$0xff] %v982_v50 }
 0x221   : > { %1254 = vmatpush1.bf16.msra.mxu1 %v1029_v51 }
 0x224   : > { %1256 = vmatmul.mubr.bf16.vlgmr.msra.gmra.mrb[32].mxu1 %v2833_v52 }
 0x225   : > { %1265 = vmatprep.mubr.bf16.mxu1 %v2836_v45 }
 0x22c   : > { %1266 = vmatmul.mubr.bf16.gmra.mrb[36].mxu1 %v2838_v17 }
 0x22d   : > { %1275 = vmatprep.mubr.bf16.mxu1 %v2839_v20  ;;  %v2860_v20 = vld [vmem:[#allocation10 + $0x18] sm:$0xff]  }
 0x234   : > { %1276 = vmatmul.mubr.bf16.gmra.mrb[40].mxu1 %v2841_v56 }
 0x235   : > { %1285 = vmatprep.mubr.bf16.mxu1 %v2842_v63 }
 0x23c   : > { %1286 = vmatmul.mubr.bf16.gmra.mrb[44].mxu1 %v2844_v54 }
 0x23d   : > { %1295 = vmatprep.mubr.bf16.mxu1 %v2845_v58 }
 0x23f   : > { %v1066_v62 = vpop.permute.xlu0 %1065  ;;  %v1076_v61 = vpop.permute.xlu1 %1075 }
 0x244   : > { %1296 = vmatmul.mubr.bf16.gmra.mrb[48].mxu1 %v2847_v21 }
 0x245   : > { %1305 = vmatprep.mubr.bf16.mxu1 %v2848_v0 }
 0x24c   : > { %1306 = vmatmul.mubr.bf16.gmra.mrb[52].mxu1 %v2850_v10 }
 0x24d   : > { %1315 = vmatprep.mubr.bf16.mxu1 %v2851_v14  ;;  %v1071_v3 = vpop.permute.xlu0 %1070  ;;  %v1081_v57 = vpop.permute.xlu1 %1080 }
 0x251   : > { %v1086_v37 = vpop.permute.xlu0 %1085 }
 0x252   : > { %v1091_v2 = vpop.permute.xlu1 %1090 }
 0x254   : > { %1316 = vmatmul.mubr.bf16.gmra.mrb[56].mxu1 %v2853_v29 }
 0x255   : > { %1325 = vmatprep.mubr.bf16.mxu1 %v2854_v35 }
 0x256   : > { %v1101_v47 = vpop.permute.xlu1 %1100 }
 0x25a   : > { %v1111_v29 = vpop.permute.xlu1 %1110 }
 0x25c   : > { %1326 = vmatmul.mubr.bf16.gmra.mrb[60].mxu1 %v2856_v59 }
 0x262   : > { %v1096_v51 = vpop.permute.xlu0 %1095 }
 0x266   : > { %v1106_v59 = vpop.permute.xlu0 %1105 }
 0x2f7   : > { %v1257_v1 = vpop.f32.mrb[32].mxu1 }
 0x2f8   : > { %v1259_v5 = vpop.f32.mrb[33].mxu1  ;;  %v1258_v7 = vadd.f32 %v1257_v1, %v1066_v62 }
 0x2f9   : > { %v1261_v16 = vpop.f32.mrb[34].mxu1  ;;  %v1260_v13 = vadd.f32 %v1259_v5, %v1066_v62  ;;  %v2861_v5 = vld [vmem:[#allocation10 + $0x20] sm:$0xff]  }
 0x2fa   : > { %v1262_v8 = vadd.f32 %v1261_v16, %v1071_v3  ;;  %v1263_v11 = vpop.f32.mrb[35].mxu1 }
 0x2fb   : > { %v1264_v15 = vadd.f32 %v1263_v11, %v1071_v3 }
 0x2fc   : > { %v1352_v6 = vpack.c.bf16 %v1262_v8, %v1258_v7 }
 0x2fd   : > { %v1424_v12 = vpack.c.bf16 %v1264_v15, %v1260_v13 }
 0x2fe   : > { %v1408_v18 = vmul.bf16 %v2857_v9, %v1352_v6  ;;  %v1121_v6 = vpop.permute.xlu1 %1120 }
 0x2ff   : > { %v1432_v19 = vmul.bf16 %v2857_v9, %v1424_v12  ;;  %v1267_v44 = vpop.f32.mrb[36].mxu1 }
 0x300   : > { %1416 = vst [vmem:[#allocation3] sm:$0xff] %v1408_v18  ;;  %v1269_v53 = vpop.f32.mrb[37].mxu1  ;;  %v1268_v23 = vadd.f32 %v1267_v44, %v1076_v61  ;;  %v1116_v18 = vpop.permute.xlu0 %1115 }
 0x301   : > { %1440 = vst [vmem:[#allocation4] sm:$0xff] %v1432_v19  ;;  %v1271_v22 = vpop.f32.mrb[38].mxu1  ;;  %v1270_v25 = vadd.f32 %v1269_v53, %v1076_v61 }
 0x302   : > { %v1272_v24 = vadd.f32 %v1271_v22, %v1081_v57  ;;  %v1273_v39 = vpop.f32.mrb[39].mxu1 }
 0x303   : > { %v1274_v26 = vadd.f32 %v1273_v39, %v1081_v57  ;;  %v2862_v57 = vld [vmem:[#allocation10 + $0x28] sm:$0xff]  }
 0x304   : > { %v1353_v27 = vpack.c.bf16 %v1272_v24, %v1268_v23 }
 0x305   : > { %v1425_v28 = vpack.c.bf16 %v1274_v26, %v1270_v25 }
 0x306   : > { %v1409_v31 = vmul.bf16 %v2858_v34, %v1353_v27 }
 0x307   : > { %v1433_v32 = vmul.bf16 %v2858_v34, %v1425_v28  ;;  %v1277_v33 = vpop.f32.mrb[40].mxu1  ;;  %v1131_v28 = vpop.permute.xlu1 %1130 }
 0x308   : > { %1417 = vst [vmem:[#allocation3 + $0x8] sm:$0xff] %v1409_v31  ;;  %v1279_v30 = vpop.f32.mrb[41].mxu1  ;;  %v1278_v38 = vadd.f32 %v1277_v33, %v1086_v37 }
 0x309   : > { %1441 = vst [vmem:[#allocation4 + $0x8] sm:$0xff] %v1433_v32  ;;  %v1281_v36 = vpop.f32.mrb[42].mxu1  ;;  %v1280_v40 = vadd.f32 %v1279_v30, %v1086_v37  ;;  %v1126_v32 = vpop.permute.xlu0 %1125  ;;  %v2863_v37 = vld [vmem:[#allocation10 + $0x30] sm:$0xff]  }
 0x30a   : > { %v1282_v41 = vadd.f32 %v1281_v36, %v1091_v2  ;;  %v1283_v55 = vpop.f32.mrb[43].mxu1 }
 0x30b   : > { %v1284_v42 = vadd.f32 %v1283_v55, %v1091_v2 }
 0x30c   : > { %v1354_v48 = vpack.c.bf16 %v1282_v41, %v1278_v38 }
 0x30d   : > { %v1426_v60 = vpack.c.bf16 %v1284_v42, %v1280_v40 }
 0x30e   : > { %v1410_v4 = vmul.bf16 %v2859_v49, %v1354_v48 }
 0x30f   : > { %v1434_v43 = vmul.bf16 %v2859_v49, %v1426_v60  ;;  %v1287_v46 = vpop.f32.mrb[44].mxu1  ;;  %v1141_v60 = vpop.permute.xlu1 %1140 }
 0x310   : > { %1418 = vst [vmem:[#allocation3 + $0x10] sm:$0xff] %v1410_v4  ;;  %v1289_v50 = vpop.f32.mrb[45].mxu1  ;;  %v1288_v45 = vadd.f32 %v1287_v46, %v1096_v51 }
 0x311   : > { %1442 = vst [vmem:[#allocation4 + $0x10] sm:$0xff] %v1434_v43  ;;  %v1291_v52 = vpop.f32.mrb[46].mxu1  ;;  %v1290_v63 = vadd.f32 %v1289_v50, %v1096_v51  ;;  %v1136_v43 = vpop.permute.xlu0 %1135  ;;  %v2864_v51 = vld [vmem:[#allocation10 + $0x38] sm:$0xff]  }
 0x312   : > { %v1292_v17 = vadd.f32 %v1291_v52, %v1101_v47  ;;  %v1293_v56 = vpop.f32.mrb[47].mxu1 }
 0x313   : > { %v1294_v54 = vadd.f32 %v1293_v56, %v1101_v47 }
 0x314   : > { %v1355_v58 = vpack.c.bf16 %v1292_v17, %v1288_v45 }
 0x315   : > { %v1427_v21 = vpack.c.bf16 %v1294_v54, %v1290_v63 }
 0x316   : > { %v1411_v0 = vmul.bf16 %v2860_v20, %v1355_v58 }
 0x317   : > { %v1435_v10 = vmul.bf16 %v2860_v20, %v1427_v21  ;;  %v1297_v14 = vpop.f32.mrb[48].mxu1 }
 0x318   : > { %1419 = vst [vmem:[#allocation3 + $0x18] sm:$0xff] %v1411_v0  ;;  %v1299_v35 = vpop.f32.mrb[49].mxu1  ;;  %v1298_v1 = vadd.f32 %v1297_v14, %v1106_v59 }
 0x319   : > { %1443 = vst [vmem:[#allocation4 + $0x18] sm:$0xff] %v1435_v10  ;;  %v1301_v62 = vpop.f32.mrb[50].mxu1  ;;  %v1300_v7 = vadd.f32 %v1299_v35, %v1106_v59 }
 0x31a   : > { %v1302_v3 = vadd.f32 %v1301_v62, %v1111_v29  ;;  %v1303_v16 = vpop.f32.mrb[51].mxu1 }
 0x31b   : > { %v1304_v8 = vadd.f32 %v1303_v16, %v1111_v29 }
 0x31c   : > { %v1356_v9 = vpack.c.bf16 %v1302_v3, %v1298_v1 }
 0x31d   : > { %v1428_v11 = vpack.c.bf16 %v1304_v8, %v1300_v7 }
 0x31e   : > { %v1412_v13 = vmul.bf16 %v2861_v5, %v1356_v9 }
 0x31f   : > { %v1436_v15 = vmul.bf16 %v2861_v5, %v1428_v11  ;;  %v1307_v61 = vpop.f32.mrb[52].mxu1 }
 0x320   : > { %1420 = vst [vmem:[#allocation3 + $0x20] sm:$0xff] %v1412_v13  ;;  %v1309_v12 = vpop.f32.mrb[53].mxu1  ;;  %v1308_v44 = vadd.f32 %v1307_v61, %v1116_v18 }
 0x321   : > { %1444 = vst [vmem:[#allocation4 + $0x20] sm:$0xff] %v1436_v15  ;;  %v1311_v19 = vpop.f32.mrb[54].mxu1  ;;  %v1310_v23 = vadd.f32 %v1309_v12, %v1116_v18 }
 0x322   : > { %v1312_v53 = vadd.f32 %v1311_v19, %v1121_v6  ;;  %v1313_v22 = vpop.f32.mrb[55].mxu1 }
 0x323   : > { %v1314_v24 = vadd.f32 %v1313_v22, %v1121_v6 }
 0x324   : > { %v1357_v34 = vpack.c.bf16 %v1312_v53, %v1308_v44 }
 0x325   : > { %v1429_v39 = vpack.c.bf16 %v1314_v24, %v1310_v23 }
 0x326   : > { %v1413_v25 = vmul.bf16 %v2862_v57, %v1357_v34 }
 0x327   : > { %v1437_v26 = vmul.bf16 %v2862_v57, %v1429_v39  ;;  %v1317_v27 = vpop.f32.mrb[56].mxu1 }
 0x328   : > { %1421 = vst [vmem:[#allocation3 + $0x28] sm:$0xff] %v1413_v25  ;;  %v1319_v31 = vpop.f32.mrb[57].mxu1  ;;  %v1318_v2 = vadd.f32 %v1317_v27, %v1126_v32 }
 0x329   : > { %1445 = vst [vmem:[#allocation4 + $0x28] sm:$0xff] %v1437_v26  ;;  %v1321_v33 = vpop.f32.mrb[58].mxu1  ;;  %v1320_v38 = vadd.f32 %v1319_v31, %v1126_v32 }
 0x32a   : > { %v1322_v30 = vadd.f32 %v1321_v33, %v1131_v28  ;;  %v1323_v36 = vpop.f32.mrb[59].mxu1 }
 0x32b   : > { %v1324_v41 = vadd.f32 %v1323_v36, %v1131_v28 }
 0x32c   : > { %v1358_v49 = vpack.c.bf16 %v1322_v30, %v1318_v2 }
 0x32d   : > { %v1430_v55 = vpack.c.bf16 %v1324_v41, %v1320_v38 }
 0x32e   : > { %v1414_v40 = vmul.bf16 %v2863_v37, %v1358_v49 }
 0x32f   : > { %v1438_v42 = vmul.bf16 %v2863_v37, %v1430_v55  ;;  %v1327_v48 = vpop.f32.mrb[60].mxu1 }
 0x330   : > { %1422 = vst [vmem:[#allocation3 + $0x30] sm:$0xff] %v1414_v40  ;;  %v1329_v4 = vpop.f32.mrb[61].mxu1  ;;  %v1328_v47 = vadd.f32 %v1327_v48, %v1136_v43 }
 0x331   : > { %1446 = vst [vmem:[#allocation4 + $0x30] sm:$0xff] %v1438_v42  ;;  %v1331_v46 = vpop.f32.mrb[62].mxu1  ;;  %v1330_v45 = vadd.f32 %v1329_v4, %v1136_v43 }
 0x332   : > { %v1332_v50 = vadd.f32 %v1331_v46, %v1141_v60  ;;  %v1333_v52 = vpop.f32.mrb[63].mxu1 }
 0x333   : > { %v1334_v17 = vadd.f32 %v1333_v52, %v1141_v60 }
 0x334   : > { %v1359_v20 = vpack.c.bf16 %v1332_v50, %v1328_v47 }
 0x335   : > { %v1431_v56 = vpack.c.bf16 %v1334_v17, %v1330_v45 }
 0x336   : > { %v1415_v63 = vmul.bf16 %v2864_v51, %v1359_v20 }
 0x337   : > { %v1439_v54 = vmul.bf16 %v2864_v51, %v1431_v56 }
 0x338   : > { %1423 = vst [vmem:[#allocation3 + $0x38] sm:$0xff] %v1415_v63 }
 0x339   : > { %1447 = vst [vmem:[#allocation4 + $0x38] sm:$0xff] %v1439_v54 }
 0x33a PF: > { %v1461_v58 = vld [vmem:[#allocation3] sm:$0xff]  ;;  %v1462_v21 = vld [vmem:[#allocation3 + $0x8] sm:$0xff]  ;;  %s2351_s20 = sshll.u32 %s3173_s11, 7  ;;  %v1463_v10 = vld [vmem:[#allocation3 + $0x10] sm:$0xff]  ;;  %s4137_s5 = sld [smem:[#allocation27_spill]] }
 0x33b   : > { %2513 = vmatprep.subr.bf16.mxu0 %v1461_v58  ;;  %s1449_s8 = sshra.s32 %s2351_s20, 4  ;;  %v1464_v14 = vld [vmem:[#allocation3 + $0x18] sm:$0xff]  ;;  %v1465_v29 = vld [vmem:[#allocation3 + $0x20] sm:$0xff]  ;;  %v1466_v35 = vld [vmem:[#allocation3 + $0x28] sm:$0xff]  ;;  %s4138_s27 = sld [smem:[#allocation19_spill]] }
 0x33c   : > { %2514 = vmatpush3.bf16.xpose.msra.mxu0 %v1461_v58  ;;  %s2352_s26 = sshll.u32 %s1449_s8, 3  ;;  %v1467_v59 = vld [vmem:[#allocation3 + $0x30] sm:$0xff]  ;;  %v2865_v11 = vld [vmem:[#allocation10] sm:$0xff]   ;;  %v2866_v13 = vld [vmem:[#allocation10 + $0x8] sm:$0xff]   ;;  %s2371_s4 = sshll.u32 %s3173_s11, 4 }
 0x33d   : > { %2515 = vmatprep.subr.bf16.mxu0 %v1462_v21  ;;  %s3845_s19 = scalar_lea.vmem [#allocation2], %s2352_s26  ;;  %2545 = vmatprep.subr.bf16.mxu1 %v2865_v11  ;;  %v2867_v15 = vld [vmem:[#allocation10 + $0x10] sm:$0xff]   ;;  %v2868_v23 = vld [vmem:[#allocation10 + $0x18] sm:$0xff]   ;;  %v2869_v25 = vld [vmem:[#allocation10 + $0x20] sm:$0xff]   ;;  %s2168_s18 = sshll.u32 %s3503_s12, 4  ;;  %s4019_s18 = int_to_ptr.vmem [resolvable:$true] %s2168_s18 }
 0x33e   : > { %v1453_v0 = vld [vmem:[%s3845_s19] sm:$0xff]  ;;  %v1454_v1 = vld [vmem:[%s3845_s19 + $0x8] sm:$0xff]  ;;  %v1455_v3 = vld [vmem:[%s3845_s19 + $0x10] sm:$0xff]  ;;  %2546 = vmatpush3.bf16.msra.mxu1 %v2865_v11  ;;  %s4139_s20 = sld [smem:[#allocation20_spill]]  ;;  %s4140_s26 = sld [smem:[#allocation28_spill]] }
 0x33f   : > { %2529 = vmatprep.mubr.bf16.mxu0 %v1453_v0  ;;  %v1468_v62 = vld [vmem:[#allocation3 + $0x38] sm:$0xff]  ;;  %v1457_v16 = vld [vmem:[%s3845_s19 + $0x20] sm:$0xff]  ;;  %v1458_v7 = vld [vmem:[%s3845_s19 + $0x28] sm:$0xff]  ;;  %2547 = vmatprep.subr.bf16.mxu1 %v2866_v13  ;;  %s4026_s16 = scalar_lea.sflag [#allocation7], %s379_s6  ;;  %s3059_s21 = scalar_lea.vmem %s4019_s18, 2048 }
 0x340   : > { %v1456_v5 = vld [vmem:[%s3845_s19 + $0x18] sm:$0xff]  ;;  %v1459_v8 = vld [vmem:[%s3845_s19 + $0x30] sm:$0xff]  ;;  %v2870_v27 = vld [vmem:[#allocation10 + $0x28] sm:$0xff]   ;;  %p3060_p1 = scmp.ne.s32.totalorder %s4019_s18, %s3059_s21 }
 0x341   : > { %v1460_v9 = vld [vmem:[%s3845_s19 + $0x38] sm:$0xff]  ;;  %v2871_v33 = vld [vmem:[#allocation10 + $0x30] sm:$0xff]   ;;  %v1855_v30 = vld [vmem:[#allocation4] sm:$0xff]  ;;  %s2372_s22 = sshll.u32 %s4138_s27, 5 }
 0x342   : > { %2548 = vmatpush3.bf16.msra.mxu1 %v2866_v13  ;;  %v2872_v2 = vld [vmem:[#allocation10 + $0x38] sm:$0xff]   ;;  %v1856_v11 = vld [vmem:[#allocation4 + $0x8] sm:$0xff]  ;;  %s2165_s17 = sadd.s32 %s2372_s22, %s2371_s4 }
 0x343   : > { %2549 = vmatprep.subr.bf16.mxu1 %v2867_v15  ;;  %s2373_s23 = sshll.u32 %s2165_s17, 7 }
 0x344   : > { %2516 = vmatpush3.bf16.xpose.msra.mxu0 %v1462_v21  ;;  %s4017_s19 = scalar_lea.hbm %s4140_s26, %s2373_s23  ;;  %p4141_p3 = scmp.ne.s32.totalorder %s4139_s20, 0 }
 0x345   : > { %2517 = vmatprep.subr.bf16.mxu0 %v1463_v10 }
 0x346   : > { %2550 = vmatpush3.bf16.msra.mxu1 %v2867_v15  ;;  %p3061_p7 = pnand %p3060_p1, %p4141_p3 }
 0x347   : > { %2551 = vmatprep.subr.bf16.mxu1 %v2868_v23 }
 0x348   : > { %p3062_p13 = pneg %p3061_p7 }
 0x34a   : > { %2552 = vmatpush3.bf16.msra.mxu1 %v2868_v23 }
 0x34b   : > { %2553 = vmatprep.subr.bf16.mxu1 %v2869_v25 }
 0x34c   : > { %2518 = vmatpush3.bf16.xpose.msra.mxu0 %v1463_v10 }
 0x34d   : > { %2519 = vmatprep.subr.bf16.mxu0 %v1464_v14 }
 0x34e   : > { %2554 = vmatpush3.bf16.msra.mxu1 %v2869_v25 }
 0x34f   : > { %2555 = vmatprep.subr.bf16.mxu1 %v2870_v27 }
 0x352   : > { %2556 = vmatpush3.bf16.msra.mxu1 %v2870_v27 }
 0x353   : > { %2557 = vmatprep.subr.bf16.mxu1 %v2871_v33 }
 0x354   : > { %2520 = vmatpush3.bf16.xpose.msra.mxu0 %v1464_v14 }
 0x355   : > { %2521 = vmatprep.subr.bf16.mxu0 %v1465_v29 }
 0x356   : > { %2558 = vmatpush3.bf16.msra.mxu1 %v2871_v33 }
 0x357   : > { %2559 = vmatprep.subr.bf16.mxu1 %v2872_v2 }
 0x35a   : > { %2560 = vmatpush3.bf16.msra.mxu1 %v2872_v2 }
 0x35b   : > { %2577 = vmatprep.subr.bf16.mxu1 %v1855_v30 }
 0x35c   : > { %2522 = vmatpush3.bf16.xpose.msra.mxu0 %v1465_v29 }
 0x35d   : > { %2523 = vmatprep.subr.bf16.mxu0 %v1466_v35 }
 0x364   : > { %2524 = vmatpush3.bf16.xpose.msra.mxu0 %v1466_v35 }
 0x365   : > { %2525 = vmatprep.subr.bf16.mxu0 %v1467_v59 }
 0x36c   : > { %2526 = vmatpush3.bf16.xpose.msra.mxu0 %v1467_v59 }
 0x36d   : > { %2527 = vmatprep.subr.bf16.mxu0 %v1468_v62 }
 0x374   : > { %2528 = vmatpush3.bf16.xpose.msra.mxu0 %v1468_v62 }
 0x37b   : > { %2530 = vmatmul.mubr.bf16.vlgmr.msra.gmra.mrb[0].mxu0 %v1454_v1 }
 0x37c   : > { %2533 = vmatprep.mubr.bf16.mxu0 %v1455_v3 }
 0x383   : > { %2534 = vmatmul.mubr.bf16.gmra.mrb[4].mxu0 %v1456_v5 }
 0x384   : > { %2537 = vmatprep.mubr.bf16.mxu0 %v1457_v16 }
 0x38b   : > { %2538 = vmatmul.mubr.bf16.gmra.mrb[8].mxu0 %v1458_v7 }
 0x38c   : > { %2541 = vmatprep.mubr.bf16.mxu0 %v1459_v8 }
 0x393   : > { %2542 = vmatmul.mubr.bf16.gmra.mrb[12].mxu0 %v1460_v9 }
 0x44e   : > { %v2531_v61 = vpop.f32.mrb[0].mxu0 }
 0x44f   : > { %1570 = vmax.xlane.f32.xlu1 %v2531_v61  ;;  %v1503_v6 = vpop.f32.mrb[1].mxu0 }
 0x450   : > { %1566 = vmax.xlane.f32.xlu0 %v1503_v6  ;;  %v2532_v12 = vpop.f32.mrb[2].mxu0 }
 0x451   : > { %v1506_v18 = vpop.f32.mrb[3].mxu0 }
 0x453   : > { %1572 = vmax.xlane.f32.xlu1 %v2532_v12 }
 0x454   : > { %1568 = vmax.xlane.f32.xlu0 %v1506_v18 }
 0x456   : > { %v3855_v19 = vpop.f32.mrb[4].mxu0 }
 0x457   : > { %v1519_v44 = vpop.f32.mrb[5].mxu0 }
 0x458   : > { %1574 = vmax.xlane.f32.xlu0 %v1519_v44  ;;  %v3857_v53 = vpop.f32.mrb[6].mxu0 }
 0x459   : > { %v1522_v57 = vpop.f32.mrb[7].mxu0 }
 0x45a   : > { %1576 = vmax.xlane.f32.xlu1 %v1522_v57 }
 0x45c   : > { %1578 = vmax.xlane.f32.xlu0 %v3855_v19 }
 0x45e   : > { %1580 = vmax.xlane.f32.xlu1 %v3857_v53  ;;  %v3861_v22 = vpop.f32.mrb[8].mxu0 }
 0x45f   : > { %v3863_v24 = vpop.f32.mrb[9].mxu0 }
 0x460   : > { %1582 = vmax.xlane.f32.xlu0 %v3863_v24  ;;  %v3866_v34 = vpop.f32.mrb[10].mxu0 }
 0x461   : > { %v3868_v39 = vpop.f32.mrb[11].mxu0 }
 0x462   : > { %1584 = vmax.xlane.f32.xlu1 %v3868_v39 }
 0x464   : > { %1586 = vmax.xlane.f32.xlu0 %v3861_v22 }
 0x466   : > { %1588 = vmax.xlane.f32.xlu1 %v3866_v34  ;;  %v3873_v26 = vpop.f32.mrb[12].mxu0 }
 0x467   : > { %v3875_v28 = vpop.f32.mrb[13].mxu0 }
 0x468   : > { %1590 = vmax.xlane.f32.xlu0 %v3875_v28  ;;  %v3878_v31 = vpop.f32.mrb[14].mxu0 }
 0x469   : > { %v3880_v32 = vpop.f32.mrb[15].mxu0 }
 0x46a   : > { %1592 = vmax.xlane.f32.xlu1 %v3880_v32 }
 0x46c   : > { %1594 = vmax.xlane.f32.xlu0 %v3873_v26 }
 0x46e   : > { %1596 = vmax.xlane.f32.xlu1 %v3878_v31 }
 0x4dc   : > { %v1571_v37 = vpop.xlane.xlu1 %1570 }
 0x4dd   : > { %v1567_v36 = vpop.xlane.xlu0 %1566  ;;  %v1600_v41 = vsub.f32 %v2531_v61, %v1571_v37 }
 0x4de   : > { %v1598_v38 = vsub.f32 %v1503_v6, %v1567_v36 }
 0x4df   : > { %v1618_v60 = vmul.f32 1.442695, %v1600_v41 }
 0x4e0   : > { %v1614_v49 = vmul.f32 1.442695, %v1598_v38  ;;  %v1573_v55 = vpop.xlane.xlu1 %1572 }
 0x4e1   : > { %v1601_v40 = vsub.f32 %v2532_v12, %v1573_v55  ;;  %v1569_v42 = vpop.xlane.xlu0 %1568 }
 0x4e2   : > { %v1599_v48 = vsub.f32 %v1506_v18, %v1569_v42  ;;  %2881 = vpow2.f32 %v1614_v49 }
 0x4e3   : > { %v1620_v4 = vmul.f32 1.442695, %v1601_v40 }
 0x4e4   : > { %v1616_v43 = vmul.f32 1.442695, %v1599_v48 }
 0x4e5   : > { %2883 = vpow2.f32 %v1620_v4  ;;  %v1575_v46 = vpop.xlane.xlu0 %1574  ;;  %v1858_v4 = vld [vmem:[#allocation4 + $0x18] sm:$0xff] }
 0x4e6   : > { %2885 = vpow2.f32 %v1616_v43  ;;  %v1602_v47 = vsub.f32 %v1519_v44, %v1575_v46  ;;  %v1859_v43 = vld [vmem:[#allocation4 + $0x20] sm:$0xff]  ;;  %v1860_v46 = vld [vmem:[#allocation4 + $0x28] sm:$0xff] }
 0x4e7   : > { %2887 = vpow2.f32 %v1618_v60  ;;  %v1577_v50 = vpop.xlane.xlu1 %1576 }
 0x4e8   : > { %v1622_v51 = vmul.f32 1.442695, %v1602_v47  ;;  %v1603_v52 = vsub.f32 %v1522_v57, %v1577_v50  ;;  %v1857_v57 = vld [vmem:[#allocation4 + $0x10] sm:$0xff]  ;;  %v1862_v50 = vld [vmem:[#allocation4 + $0x38] sm:$0xff] }
 0x4e9   : > { %v1579_v45 = vpop.xlane.xlu0 %1578  ;;  %v1861_v47 = vld [vmem:[#allocation4 + $0x30] sm:$0xff] }
 0x4ea   : > { %v1624_v17 = vmul.f32 1.442695, %v1603_v52  ;;  %v1604_v20 = vsub.f32 %v3855_v19, %v1579_v45  ;;  %2889 = vpow2.f32 %v1622_v51  ;;  %v2873_v51 = vld [vmem:[#allocation11] sm:$0xff]   ;;  %v3943_v52 = vld [vmem:[#allocation11 + $0x8] sm:$0xff]   ;;  %v3946_v45 = vld [vmem:[#allocation11 + $0x10] sm:$0xff]  }
 0x4eb   : > { %v1581_v56 = vpop.xlane.xlu1 %1580  ;;  %2609 = vmatprep.subr.bf16.mxu0 %v2873_v51 }
 0x4ec   : > { %2891 = vpow2.f32 %v1624_v17  ;;  %v1626_v63 = vmul.f32 1.442695, %v1604_v20  ;;  %v1605_v54 = vsub.f32 %v3857_v53, %v1581_v56  ;;  %v3887_v21 = vpop.eup %2881  ;;  %2610 = vmatpush3.bf16.msra.mxu0 %v2873_v51  ;;  %v3950_v17 = vld [vmem:[#allocation11 + $0x18] sm:$0xff]   ;;  %v3954_v20 = vld [vmem:[#allocation11 + $0x20] sm:$0xff]   ;;  %v3958_v56 = vld [vmem:[#allocation11 + $0x28] sm:$0xff]  }
 0x4ed   : > { %v1583_v58 = vpop.xlane.xlu0 %1582  ;;  %2611 = vmatprep.subr.bf16.mxu0 %v3943_v52 }
 0x4ee   : > { %v1628_v0 = vmul.f32 1.442695, %v1605_v54  ;;  %v1606_v10 = vsub.f32 %v3863_v24, %v1583_v58  ;;  %2893 = vpow2.f32 %v1626_v63  ;;  %v3962_v63 = vld [vmem:[#allocation11 + $0x30] sm:$0xff]  }
 0x4ef   : > { %v3890_v14 = vpop.eup %2883  ;;  %v1585_v29 = vpop.xlane.xlu1 %1584 }
 0x4f0   : > { %v3892_v35 = vpop.eup %2885  ;;  %2895 = vpow2.f32 %v1628_v0  ;;  %v1630_v59 = vmul.f32 1.442695, %v1606_v10  ;;  %v1607_v62 = vsub.f32 %v3868_v39, %v1585_v29  ;;  %2612 = vmatpush3.bf16.msra.mxu0 %v3943_v52 }
 0x4f1   : > { %v3895_v1 = vpop.eup %2887  ;;  %v1587_v3 = vpop.xlane.xlu0 %1586  ;;  %v1646_v5 = vpack.c.bf16 %v3892_v35, %v3887_v21  ;;  %2613 = vmatprep.subr.bf16.mxu0 %v3946_v45 }
 0x4f2   : > { %v1632_v16 = vmul.f32 1.442695, %v1607_v62  ;;  %v1608_v7 = vsub.f32 %v3861_v22, %v1587_v3  ;;  %v1647_v8 = vpack.c.bf16 %v3890_v14, %v3895_v1  ;;  %2897 = vpow2.f32 %v1630_v59 }
 0x4f3   : > { %2561 = vmatprep.mubr.bf16.mxu1 %v1646_v5  ;;  %v1589_v9 = vpop.xlane.xlu1 %1588 }
 0x4f4   : > { %2899 = vpow2.f32 %v1632_v16  ;;  %v1634_v13 = vmul.f32 1.442695, %v1608_v7  ;;  %v1609_v15 = vsub.f32 %v3866_v34, %v1589_v9  ;;  %2562 = vmatmul.mubr.bf16.vlgmr.msra.gmra.mrb[0].mxu1 %v1647_v8  ;;  %v3903_v61 = vpop.eup %2889  ;;  %2614 = vmatpush3.bf16.msra.mxu0 %v3946_v45 }
 0x4f5   : > { %v1591_v6 = vpop.xlane.xlu0 %1590  ;;  %2578 = vmatpush3.bf16.msra.mxu1 %v1855_v30  ;;  %2615 = vmatprep.subr.bf16.mxu0 %v3950_v17 }
 0x4f6   : > { %v3905_v12 = vpop.eup %2891  ;;  %v1636_v18 = vmul.f32 1.442695, %v1609_v15  ;;  %v1610_v19 = vsub.f32 %v3875_v28, %v1591_v6  ;;  %2579 = vmatprep.subr.bf16.mxu1 %v1856_v11  ;;  %2901 = vpow2.f32 %v1634_v13 }
 0x4f7   : > { %v1593_v44 = vpop.xlane.xlu1 %1592  ;;  %v1648_v53 = vpack.c.bf16 %v3905_v12, %v3903_v61 }
 0x4f8   : > { %2903 = vpow2.f32 %v1636_v18  ;;  %v1638_v22 = vmul.f32 1.442695, %v1610_v19  ;;  %v1611_v23 = vsub.f32 %v3880_v32, %v1593_v44  ;;  %v3911_v24 = vpop.eup %2893  ;;  %2616 = vmatpush3.bf16.msra.mxu0 %v3950_v17 }
 0x4f9   : > { %2565 = vmatprep.mubr.bf16.mxu1 %v1648_v53  ;;  %v1595_v34 = vpop.xlane.xlu0 %1594  ;;  %2580 = vmatpush3.bf16.msra.mxu1 %v1856_v11 }
 0x4fa   : > { %v3913_v39 = vpop.eup %2895  ;;  %v1640_v25 = vmul.f32 1.442695, %v1611_v23  ;;  %v1612_v27 = vsub.f32 %v3873_v26, %v1595_v34  ;;  %2581 = vmatprep.subr.bf16.mxu1 %v1857_v57  ;;  %2905 = vpow2.f32 %v1638_v22  ;;  %2617 = vmatprep.subr.bf16.mxu0 %v3954_v20 }
 0x4fb   : > { %v1597_v28 = vpop.xlane.xlu1 %1596  ;;  %v1649_v33 = vpack.c.bf16 %v3913_v39, %v3911_v24 }
 0x4fc   : > { %2907 = vpow2.f32 %v1640_v25  ;;  %v1642_v2 = vmul.f32 1.442695, %v1612_v27  ;;  %v1613_v32 = vsub.f32 %v3878_v31, %v1597_v28  ;;  %v3919_v30 = vpop.eup %2897  ;;  %2618 = vmatpush3.bf16.msra.mxu0 %v3954_v20 }
 0x4fd   : > { %2566 = vmatmul.mubr.bf16.gmra.mrb[4].mxu1 %v1649_v33  ;;  %2619 = vmatprep.subr.bf16.mxu0 %v3958_v56 }
 0x4fe   : > { %v3921_v37 = vpop.eup %2899  ;;  %v1644_v36 = vmul.f32 1.442695, %v1613_v32  ;;  %2582 = vmatpush3.bf16.msra.mxu1 %v1857_v57  ;;  %2909 = vpow2.f32 %v1642_v2 }
 0x4ff   : > { %v1650_v26 = vpack.c.bf16 %v3921_v37, %v3919_v30  ;;  %2583 = vmatprep.subr.bf16.mxu1 %v1858_v4 }
 0x500   : > { %2911 = vpow2.f32 %v1644_v36  ;;  %v3925_v38 = vpop.eup %2901  ;;  %2620 = vmatpush3.bf16.msra.mxu0 %v3958_v56 }
 0x501   : > { %2569 = vmatprep.mubr.bf16.mxu1 %v1650_v26  ;;  %2621 = vmatprep.subr.bf16.mxu0 %v3962_v63 }
 0x502   : > { %v3927_v41 = vpop.eup %2903  ;;  %2584 = vmatpush3.bf16.msra.mxu1 %v1858_v4 }
 0x503   : > { %v1651_v31 = vpack.c.bf16 %v3927_v41, %v3925_v38  ;;  %2585 = vmatprep.subr.bf16.mxu1 %v1859_v43 }
 0x504   : > { %v3931_v49 = vpop.eup %2905  ;;  %2622 = vmatpush3.bf16.msra.mxu0 %v3962_v63 }
 0x505   : > { %2570 = vmatmul.mubr.bf16.gmra.mrb[8].mxu1 %v1651_v31 }
 0x506   : > { %v3933_v55 = vpop.eup %2907  ;;  %2586 = vmatpush3.bf16.msra.mxu1 %v1859_v43 }
 0x507   : > { %v1652_v40 = vpack.c.bf16 %v3933_v55, %v3931_v49  ;;  %2587 = vmatprep.subr.bf16.mxu1 %v1860_v46 }
 0x508   : > { %v3937_v42 = vpop.eup %2909 }
 0x509   : > { %2573 = vmatprep.mubr.bf16.mxu1 %v1652_v40 }
 0x50a   : > { %v3939_v48 = vpop.eup %2911  ;;  %2588 = vmatpush3.bf16.msra.mxu1 %v1860_v46 }
 0x50b   : > { %v1653_v60 = vpack.c.bf16 %v3939_v48, %v3937_v42  ;;  %2589 = vmatprep.subr.bf16.mxu1 %v1861_v47 }
 0x50d   : > { %2574 = vmatmul.mubr.bf16.gmra.mrb[12].mxu1 %v1653_v60 }
 0x50e   : > { %2590 = vmatpush3.bf16.msra.mxu1 %v1861_v47 }
 0x50f   : > { %2591 = vmatprep.subr.bf16.mxu1 %v1862_v50 }
 0x512   : > { %2592 = vmatpush3.bf16.msra.mxu1 %v1862_v50 }
 0x513   : > { %2641 = vmatprep.subr.bf16.mxu1 %v2873_v51 }
 0x5c7   : > { %v2563_v54 = vpop.f32.mrb[0].mxu1 }
 0x5c8   : > { %2913 = vrcp.f32 %v2563_v54  ;;  %v1752_v58 = vpop.f32.mrb[1].mxu1 }
 0x5c9   : > { %2915 = vrcp.f32 %v1752_v58  ;;  %v2564_v0 = vpop.f32.mrb[2].mxu1 }
 0x5ca   : > { %2917 = vrcp.f32 %v2564_v0  ;;  %v1755_v10 = vpop.f32.mrb[3].mxu1 }
 0x5cb   : > { %2919 = vrcp.f32 %v1755_v10 }
 0x5d0   : > { %v2567_v29 = vpop.f32.mrb[4].mxu1 }
 0x5d1   : > { %2921 = vrcp.f32 %v2567_v29  ;;  %v1768_v59 = vpop.f32.mrb[5].mxu1 }
 0x5d2   : > { %v2914_v62 = vpop.eup %2913  ;;  %2923 = vrcp.f32 %v1768_v59  ;;  %v2568_v3 = vpop.f32.mrb[6].mxu1 }
 0x5d3   : > { %v2916_v5 = vpop.eup %2915  ;;  %2925 = vrcp.f32 %v2568_v3  ;;  %v1771_v16 = vpop.f32.mrb[7].mxu1  ;;  %v1833_v9 = vmul.f32 %v2914_v62, %v3895_v1 }
 0x5d4   : > { %v2918_v7 = vpop.eup %2917  ;;  %2927 = vrcp.f32 %v1771_v16  ;;  %v1831_v13 = vmul.f32 %v2916_v5, %v3887_v21 }
 0x5d5   : > { %v2920_v8 = vpop.eup %2919  ;;  %v1834_v11 = vmul.f32 %v2918_v7, %v3890_v14 }
 0x5d6   : > { %v1832_v15 = vmul.f32 %v2920_v8, %v3892_v35 }
 0x5d7   : > { %v1848_v6 = vpack.c.bf16 %v1834_v11, %v1833_v9 }
 0x5d8   : > { %v2571_v18 = vpop.f32.mrb[8].mxu1  ;;  %v1847_v19 = vpack.c.bf16 %v1832_v15, %v1831_v13 }
 0x5d9   : > { %2929 = vrcp.f32 %v2571_v18  ;;  %v1784_v44 = vpop.f32.mrb[9].mxu1  ;;  %v2361_v18 = vld [vmem:[%s4137_s5] ss:$0 sm:$0xff]  ;;  %s3202_s5 = smov [#allocation13]  }
 0x5da   : > { %2931 = vrcp.f32 %v1784_v44  ;;  %v2572_v53 = vpop.f32.mrb[10].mxu1  ;;  %2593 = vmatprep.mubr.bf16.mxu1 %v1847_v19  ;;  %s3063_s27 = sshll.u32 %s3202_s5, 4  ;;  %s3064_s27 = int_to_ptr.vmem [resolvable:$false] %s3063_s27 }
 0x5db   : > { %v2922_v57 = vpop.eup %2921  ;;  %2933 = vrcp.f32 %v2572_v53  ;;  %v1787_v22 = vpop.f32.mrb[11].mxu1  ;;  %2594 = vmatmul.mubr.bf16.vlgmr.msra.gmra.mrb[16].mxu1 %v1848_v6  ;;  %s3065_s4 = scalar_lea.vmem %s3064_s27, 4096  ;;  %p3066_p9 = scmp.lt.s32.totalorder %s4019_s18, %s3064_s27 }
 0x5dc   : > { %v2924_v23 = vpop.eup %2923  ;;  %2935 = vrcp.f32 %v1787_v22  ;;  %2649 = vmatpush3.bf16.msra.mxu1 %v2873_v51  ;;  %v1837_v35 = vmul.f32 %v2922_v57, %v3911_v24  ;;  %p3067_p11 = scmp.lt.s32.totalorder %s3065_s4, %s3059_s21 }
 0x5dd   : > { %v2926_v14 = vpop.eup %2925  ;;  %2642 = vmatprep.subr.bf16.mxu1 %v3943_v52  ;;  %v1835_v34 = vmul.f32 %v2924_v23, %v3903_v61 }
 0x5de   : > { %v2928_v21 = vpop.eup %2927  ;;  %v1838_v1 = vmul.f32 %v2926_v14, %v3913_v39  ;;  %p3068_p5 = por %p3067_p11, %p3066_p9 }
 0x5df   : > { %v1836_v25 = vmul.f32 %v2928_v21, %v3905_v12 }
 0x5e0   : > { %v2575_v27 = vpop.f32.mrb[12].mxu1  ;;  %v1850_v28 = vpack.c.bf16 %v1838_v1, %v1837_v35  ;;  %2650 = vmatpush3.bf16.msra.mxu1 %v3943_v52  ;;  %p3069_p8 = pnand %p3068_p5, %p3062_p13 }
 0x5e1   : > { %2937 = vrcp.f32 %v2575_v27  ;;  %v1800_v33 = vpop.f32.mrb[13].mxu1  ;;  %v1849_v2 = vpack.c.bf16 %v1836_v25, %v1835_v34  ;;  %2643 = vmatprep.subr.bf16.mxu1 %v3946_v45 }
 0x5e2   : > { %2939 = vrcp.f32 %v1800_v33  ;;  %v2576_v32 = vpop.f32.mrb[14].mxu1 }
 0x5e3   : > { %v2930_v36 = vpop.eup %2929  ;;  %2941 = vrcp.f32 %v2576_v32  ;;  %v1803_v24 = vpop.f32.mrb[15].mxu1  ;;  %2597 = vmatprep.mubr.bf16.mxu1 %v1849_v2 }
 0x5e4   : > { %v2932_v39 = vpop.eup %2931  ;;  %2943 = vrcp.f32 %v1803_v24  ;;  %2598 = vmatmul.mubr.bf16.gmra.mrb[20].mxu1 %v1850_v28  ;;  %v1841_v26 = vmul.f32 %v2930_v36, %v3925_v38 }
 0x5e5   : > { %v2934_v61 = vpop.eup %2933  ;;  %2651 = vmatpush3.bf16.msra.mxu1 %v3946_v45  ;;  %v1839_v40 = vmul.f32 %v2932_v39, %v3919_v30 }
 0x5e6   : > { %v2936_v12 = vpop.eup %2935  ;;  %v1842_v31 = vmul.f32 %v2934_v61, %v3927_v41  ;;  %2644 = vmatprep.subr.bf16.mxu1 %v3950_v17 }
 0x5e7   : > { %v1840_v60 = vmul.f32 %v2936_v12, %v3921_v37 }
 0x5e8   : > { %v1852_v4 = vpack.c.bf16 %v1842_v31, %v1841_v26 }
 0x5e9   : > { %v1851_v43 = vpack.c.bf16 %v1840_v60, %v1839_v40  ;;  %2652 = vmatpush3.bf16.msra.mxu1 %v3950_v17  ;;  %v2880_v17 = vld [vmem:[#allocation11 + $0x38] sm:$0xff]  }
 0x5ea   : > { %2645 = vmatprep.subr.bf16.mxu1 %v3954_v20  ;;  %2623 = vmatprep.subr.bf16.mxu0 %v2880_v17 }
 0x5eb   : > { %v2938_v46 = vpop.eup %2937  ;;  %2601 = vmatprep.mubr.bf16.mxu1 %v1851_v43  ;;  %2624 = vmatpush3.bf16.msra.mxu0 %v2880_v17 }
 0x5ec   : > { %v2940_v47 = vpop.eup %2939  ;;  %2602 = vmatmul.mubr.bf16.gmra.mrb[24].mxu1 %v1852_v4  ;;  %v1845_v41 = vmul.f32 %v2938_v46, %v3937_v42 }
 0x5ed   : > { %v2942_v50 = vpop.eup %2941  ;;  %2653 = vmatpush3.bf16.msra.mxu1 %v3954_v20  ;;  %v1843_v37 = vmul.f32 %v2940_v47, %v3931_v49 }
 0x5ee   : > { %v2944_v38 = vpop.eup %2943  ;;  %v1846_v30 = vmul.f32 %v2942_v50, %v3939_v48  ;;  %2646 = vmatprep.subr.bf16.mxu1 %v3958_v56 }
 0x5ef   : > { %v1844_v51 = vmul.f32 %v2944_v38, %v3933_v55 }
 0x5f0   : > { %v1854_v52 = vpack.c.bf16 %v1846_v30, %v1845_v41 }
 0x5f1   : > { %v1853_v45 = vpack.c.bf16 %v1844_v51, %v1843_v37  ;;  %2654 = vmatpush3.bf16.msra.mxu1 %v3958_v56 }
 0x5f2   : > { %2647 = vmatprep.subr.bf16.mxu1 %v3962_v63 }
 0x5f3   : > { %2605 = vmatprep.mubr.bf16.mxu1 %v1853_v45 }
 0x5f4   : > { %2606 = vmatmul.mubr.bf16.gmra.mrb[28].mxu1 %v1854_v52 }
 0x5f5   : > { %2655 = vmatpush3.bf16.msra.mxu1 %v3962_v63 }
 0x5f6   : > { %2648 = vmatprep.subr.bf16.mxu1 %v2880_v17 }
 0x5f9   : > { %2656 = vmatpush3.bf16.msra.mxu1 %v2880_v17 }
 0x6ae   : > { %v2595_v42 = vpop.f32.mrb[16].mxu1 }
 0x6af   : > { %v1897_v48 = vpop.f32.mrb[17].mxu1 }
 0x6b0   : > { %v2596_v49 = vpop.f32.mrb[18].mxu1 }
 0x6b1   : > { %v1961_v20 = vpack.c.bf16 %v2596_v49, %v2595_v42  ;;  %v1900_v55 = vpop.f32.mrb[19].mxu1 }
 0x6b2   : > { %v1960_v54 = vpack.c.bf16 %v1900_v55, %v1897_v48 }
 0x6b4   : > { %2625 = vmatprep.mubr.bf16.mxu0 %v1960_v54 }
 0x6b5   : > { %2626 = vmatmul.mubr.bf16.vlgmr.msra.gmra.mrb[16].mxu0 %v1961_v20 }
 0x6b7   : > { %v2599_v56 = vpop.f32.mrb[20].mxu1 }
 0x6b8   : > { %v1913_v58 = vpop.f32.mrb[21].mxu1 }
 0x6b9   : > { %v2600_v0 = vpop.f32.mrb[22].mxu1 }
 0x6ba   : > { %v1963_v10 = vpack.c.bf16 %v2600_v0, %v2599_v56  ;;  %v1916_v29 = vpop.f32.mrb[23].mxu1 }
 0x6bb   : > { %v1962_v59 = vpack.c.bf16 %v1916_v29, %v1913_v58 }
 0x6bd   : > { %2629 = vmatprep.mubr.bf16.mxu0 %v1962_v59 }
 0x6be   : > { %2630 = vmatmul.mubr.bf16.gmra.mrb[20].mxu0 %v1963_v10 }
 0x6bf   : > { %v2603_v63 = vpop.f32.mrb[24].mxu1 }
 0x6c0   : > { %v1929_v62 = vpop.f32.mrb[25].mxu1 }
 0x6c1   : > { %v2604_v3 = vpop.f32.mrb[26].mxu1 }
 0x6c2   : > { %v1965_v5 = vpack.c.bf16 %v2604_v3, %v2603_v63  ;;  %v1932_v16 = vpop.f32.mrb[27].mxu1 }
 0x6c3   : > { %v1964_v7 = vpack.c.bf16 %v1932_v16, %v1929_v62 }
 0x6c5   : > { %2633 = vmatprep.mubr.bf16.mxu1 %v1964_v7 }
 0x6c6   : > { %2634 = vmatmul.mubr.bf16.vlgmr.msra.gmra.mrb[32].mxu1 %v1965_v5 }
 0x6c7   : > { %v2607_v8 = vpop.f32.mrb[28].mxu1 }
 0x6c8   : > { %v1945_v9 = vpop.f32.mrb[29].mxu1 }
 0x6c9   : > { %v2608_v11 = vpop.f32.mrb[30].mxu1 }
 0x6ca   : > { %v1967_v13 = vpack.c.bf16 %v2608_v11, %v2607_v8  ;;  %v1948_v15 = vpop.f32.mrb[31].mxu1 }
 0x6cb   : > { %v1966_v6 = vpack.c.bf16 %v1948_v15, %v1945_v9 }
 0x6cd   : > { %2637 = vmatprep.mubr.bf16.mxu1 %v1966_v6 }
 0x6ce   : > { %2638 = vmatmul.mubr.bf16.gmra.mrb[36].mxu1 %v1967_v13 }
 0x788   : > { %v2627_v19 = vpop.f32.mrb[16].mxu0 }
 0x789   : > { %v2082_v44 = vadd.f32 %v2627_v19, %v2361_v18  ;;  %v2073_v53 = vpop.f32.mrb[17].mxu0 }
 0x78a   : > { %v2074_v57 = vadd.f32 %v2361_v18, %v2073_v53  ;;  %v2628_v22 = vpop.f32.mrb[18].mxu0 }
 0x78b   : > { %2138 = vst [vmem:[%s3503_s12 + $0x10] sm:$0xff] %v2082_v44  ;;  %v2085_v23 = vadd.f32 %v2628_v22, %v2361_v18  ;;  %v2076_v14 = vpop.f32.mrb[19].mxu0 }
 0x78c   : > { %2136 = vst [vmem:[%s3503_s12] sm:$0xff] %v2074_v57  ;;  %v2077_v21 = vadd.f32 %v2361_v18, %v2076_v14 }
 0x78d   : > { %2139 = vst [vmem:[%s3503_s12 + $0x18] sm:$0xff] %v2085_v23 }
 0x78e   : > { %2137 = vst [vmem:[%s3503_s12 + $0x8] sm:$0xff] %v2077_v21 }
 0x791   : > { %v2631_v35 = vpop.f32.mrb[20].mxu0 }
 0x792   : > { %v2098_v1 = vadd.f32 %v2631_v35, %v2361_v18  ;;  %v2089_v34 = vpop.f32.mrb[21].mxu0 }
 0x793   : > { %v2090_v25 = vadd.f32 %v2361_v18, %v2089_v34  ;;  %v2632_v27 = vpop.f32.mrb[22].mxu0 }
 0x794   : > { %2142 = vst [vmem:[%s3503_s12 + $0x30] sm:$0xff] %v2098_v1  ;;  %v2101_v28 = vadd.f32 %v2632_v27, %v2361_v18  ;;  %v2092_v33 = vpop.f32.mrb[23].mxu0 }
 0x795   : > { %2140 = vst [vmem:[%s3503_s12 + $0x20] sm:$0xff] %v2090_v25  ;;  %v2093_v2 = vadd.f32 %v2361_v18, %v2092_v33 }
 0x796   : > { %2143 = vst [vmem:[%s3503_s12 + $0x38] sm:$0xff] %v2101_v28 }
 0x797   : > { %2141 = vst [vmem:[%s3503_s12 + $0x28] sm:$0xff] %v2093_v2 }
 0x799   : > { %v2635_v32 = vpop.f32.mrb[32].mxu1 }
 0x79a   : > { %v2114_v36 = vadd.f32 %v2635_v32, %v2361_v18  ;;  %v2105_v24 = vpop.f32.mrb[33].mxu1 }
 0x79b   : > { %v2106_v39 = vadd.f32 %v2361_v18, %v2105_v24  ;;  %v2636_v61 = vpop.f32.mrb[34].mxu1 }
 0x79c   : > { %2146 = vst [vmem:[%s3503_s12 + $0x50] sm:$0xff] %v2114_v36  ;;  %v2117_v12 = vadd.f32 %v2636_v61, %v2361_v18  ;;  %v2108_v26 = vpop.f32.mrb[35].mxu1 }
 0x79d   : > { %2144 = vst [vmem:[%s3503_s12 + $0x40] sm:$0xff] %v2106_v39  ;;  %v2109_v31 = vadd.f32 %v2361_v18, %v2108_v26 }
 0x79e   : > { %2147 = vst [vmem:[%s3503_s12 + $0x58] sm:$0xff] %v2117_v12 }
 0x79f   : > { %2145 = vst [vmem:[%s3503_s12 + $0x48] sm:$0xff] %v2109_v31 }
 0x7a1   : > { %v2639_v40 = vpop.f32.mrb[36].mxu1 }
 0x7a2   : > { %v2130_v60 = vadd.f32 %v2639_v40, %v2361_v18  ;;  %v2121_v4 = vpop.f32.mrb[37].mxu1 }
 0x7a3   : > { %v2122_v43 = vadd.f32 %v2361_v18, %v2121_v4  ;;  %v2640_v46 = vpop.f32.mrb[38].mxu1 }
 0x7a4   : > { %2150 = vst [vmem:[%s3503_s12 + $0x70] sm:$0xff] %v2130_v60  ;;  %v2133_v47 = vadd.f32 %v2640_v46, %v2361_v18  ;;  %v2124_v50 = vpop.f32.mrb[39].mxu1 }
 0x7a5   : > { %2148 = vst [vmem:[%s3503_s12 + $0x60] sm:$0xff] %v2122_v43  ;;  %v2125_v38 = vadd.f32 %v2361_v18, %v2124_v50 }
 0x7a6   : > { %2151 = vst [vmem:[%s3503_s12 + $0x78] sm:$0xff] %v2133_v47 }
 0x7a7   : > { %2149 = vst [vmem:[%s3503_s12 + $0x68] sm:$0xff] %v2125_v38 }
 0x7a8   : > { %3072 = shalt.err (!%p3069_p8)
}
 0x7a9   : > { %s3073_s6 = scalar_lea.hbm %s4017_s19, 2048  ;;  %s3077_s17 = scalar_lea.hbm %s4140_s26, 8192 }
 0x7aa   : > { %p3074_p12 = scmp.ne.s32.totalorder %s4017_s19, %s3073_s6  ;;  %p3078_p10 = scmp.lt.u32.totalorder %s4017_s19, %s4140_s26 }
 0x7ab   : > { %p3079_p0 = scmp.lt.u32.totalorder %s3077_s17, %s3073_s6  ;;  %p3081_p1 = scmp.lt.u32.totalorder %s3073_s6, %s4017_s19 }
 0x7ac   : > { %p3075_p2 = pnand %p3074_p12, %p4141_p3 }
 0x7ad   : > { %p3080_p4 = por %p3079_p0, %p3078_p10 }
 0x7ae   : > { %p3076_p6 = pneg %p3075_p2 }
 0x7af   : > { %p3082_p7 = por %p3081_p1, %p3080_p4 }
 0x7b1   : > { %p3083_p13 = pnand %p3082_p7, %p3076_p6 }
 0x7b3   : > { %3086 = shalt.err (!%p3083_p13)
}
 0x7b4   : > { %s3203_s8 = smov 128   ;;  %s3204_s21 = smov 8  }
 0x7b5   : > { %2671 = dma.vmem_to_hbm [thread:$0]  (%p4141_p3), %s4019_s18, 2048, %s4017_s19, %s4026_s16, %s3203_s8, %s3203_s8, %s3204_s21  }
 0x7b6 PF: > { %s4142_s5 = sld [smem:[#allocation18_spill]]  ;;  %s4143_s27 = sld [smem:[#allocation21_spill]] }
 0x7b7   : > { %p2698_p9 = scmp.ge.s32.totalorder %s3189_s15, 2 }
 0x7bc   : > { %s2183_s4 = sand.u32 1, %s4142_s5   ;;  %p4144_p11 = scmp.ne.s32.totalorder %s4143_s27, 0 }
 0x7bd   : > { %s2184_s6 = scalar_lea.sflag [#allocation7], %s2183_s4 }
 0x7be   : > { %p2688_p5 = pnand %p2698_p9, %p4144_p11 }
 0x7c0   : > { %3144 = dma.done.wait (!%p2688_p5), %s2184_s6, 2048  }
 0x7c1   : > { %3146 = vsyncadd (!%p2688_p5), %s2184_s6, 4294965248  ;;  %s26_s15 = sadd.s32 1, %s3189_s15   ;;  %s4145_s18 = smov %s3433_s30 }
 0x7c2   : > { %p23_p8 = scmp.ge.s32.totalorder %s26_s15, 6   ;;  %s4146_s27 = smov %s3153_s28 }
 0x7c3   : > { %s4147_s28 = smov %s3157_s29  ;;  %s4148_s29 = smov %s3438_s25 }
 0x7c4   : > { %s4149_s30 = smov %s3165_s9  ;;  %s4150_s9 = smov %s3169_s10 }
 0x7c5   : > { %s4151_s10 = smov %s4145_s18  ;;  %s4152_s11 = smov %s3181_s13 }
 0x7c6   : > { %s4153_s12 = smov %s3185_s14  ;;  %s4154_s13 = smov %s4157_s1 }
 0x7c7   : > { %s4155_s14 = smov %s4161_s24  ;;  %25 = sbr.rel (!%p23_p8) target bundleno = 19 (0x13), region = 114 }
 0x7ce   :  { %2189 = vsyncpa [#allocation6], 1 }
 0x7cf   :  { %2191 = vsyncpa [#allocation6 + $0x1], 1 }
 0x7d0   :  { %2192 = vsyncpa [#allocation9], 1 }
 0x7d1   :  { %2193 = vsyncpa [#allocation12], 1 }
 0x7d2   :  { %2194 = vsyncpa [#allocation7], 1 }
 0x7d3   :  { %2196 = vsyncpa [#allocation7 + $0x1], 1 }

</bundles_post_ra>
